<compile_context>
chip_gen: v7x
topology: tpu7x:2x2x1
jax: 0.10.0
libtpu: 0.0.40
codegen_flags: <defaults>
</compile_context>

<pallas_src>
import math
import functools

import jax
import jax.numpy as jnp
from jax import lax
from jax.experimental import pallas as pl
from jax.experimental.pallas import tpu as pltpu


# ----------------------------------------------------------------------------
# Fused whole-network Pallas kernel (channels-first, time-on-lanes)
# ----------------------------------------------------------------------------

def _mstcn_kernel(stage_layer_counts, T, n_inputs, *refs):
    """refs = (*input_refs, *flat_weight_refs, o_ref).

    Runs the complete multi-stage forward for one batch element.  Layer counts
    and dilations are static, so the Python loops unroll at trace time and all
    intermediate activations stay in VMEM / vregs (the tiny 3-channel
    inter-stage tensor in particular never touches HBM).
    """
    in_refs = refs[:n_inputs]
    o_ref = refs[-1]
    wq = list(refs[n_inputs:-1])
    pop = lambda: wq.pop(0)

    def conv1x1(w, b, x_bf16):
        # (Cout, Cin) bf16 @ (Cin, T) bf16 -> f32 accumulate, f32 bias add.
        return jnp.dot(w, x_bf16, preferred_element_type=jnp.float32) + b

    h = None  # previous stage logits, f32 (num_classes, T)

    for s, num_layers in enumerate(stage_layer_counts):
        # ------------------ stage input 1x1 conv ------------------------
        if s == 0:
            # Split-K over the separate rgb / flow inputs: each (T, F) block is
            # cast to bf16 in-kernel and contracted against its (C, F) weight
            # chunk via an A·Bᵀ-style dot_general — no HBM concat / cast pass.
            w_chunks = [pop() for _ in range(n_inputs)]
            b_in = pop()[...]                                   # (C, 1) f32
            parts = []
            for x_ref, w_ref in zip(in_refs, w_chunks):
                xb = x_ref[0].astype(jnp.bfloat16)              # (T, F)
                parts.append(lax.dot_general(
                    w_ref[...], xb, (((1,), (1,)), ((), ())),
                    preferred_element_type=jnp.float32))        # (C, T)
            a = sum(parts) + b_in
        else:
            # F.softmax over channels (sublane axis) of the previous stage's
            # logits — fused in-kernel, exact division (no approx reciprocal
            # so errors don't compound across stages).
            m = jnp.max(h, axis=0, keepdims=True)
            e = jnp.exp(h - m)
            p = e / jnp.sum(e, axis=0, keepdims=True)
            w_in, b_in = pop()[...], pop()[...]
            a = conv1x1(w_in, b_in, p.astype(jnp.bfloat16))     # (C, T) f32

        # ------------------ dilated residual layers ---------------------
        if num_layers > 0:
            wd_ref, bd_ref, w1_ref, b1_ref = pop(), pop(), pop(), pop()
        C = a.shape[0]
        # TODO(synk): convert to lax.fori_loop (SMEM dilation table) for
        # production layer counts to bound live ranges / compile time.
        for i in range(num_layers):
            d = 2 ** i
            a_bf = a.astype(jnp.bfloat16)                       # cast once per layer
            if d >= T:
                a_prev = jnp.zeros_like(a_bf)
                a_next = jnp.zeros_like(a_bf)
            else:
                zpad = jnp.zeros((C, d), jnp.bfloat16)
                # Zero-padded time shifts along the lane axis ==
                # Conv1d(kernel=3, padding=d, dilation=d) taps.
                a_prev = jnp.concatenate([zpad, a_bf[:, :T - d]], axis=1)  # a[t-d]
                a_next = jnp.concatenate([a_bf[:, d:], zpad], axis=1)      # a[t+d]
            # Fold the 3 taps into one K=3C matmul (tap-major packed weight).
            acat = jnp.concatenate([a_prev, a_bf, a_next], axis=0)         # (3C, T) bf16
            z = jnp.maximum(conv1x1(wd_ref[i], bd_ref[i], acat), 0.0)      # relu(dilated)
            y = conv1x1(w1_ref[i], b1_ref[i], z.astype(jnp.bfloat16))      # 1x1 conv
            # TODO(synk): nn.Dropout treated as identity (eval-mode forward).
            a = a + y                                                      # residual (f32)

        # ------------------ stage output 1x1 conv -----------------------
        w_out, b_out = pop()[...], pop()[...]
        out = conv1x1(w_out, b_out, a.astype(jnp.bfloat16))                # (ncls, T) f32
        o_ref[s, 0] = out            # lane-dense (T on last dim) store
        h = out                      # next stage input, stays in VMEM


# ----------------------------------------------------------------------------
# Parameter init (PyTorch Conv1d-style uniform(-1/sqrt(fan_in), .), stored
# channels-first so a real Conv1d checkpoint maps directly)
# ----------------------------------------------------------------------------

def _conv1x1_params(key, cin, cout):
    # PyTorch Conv1d(cin, cout, 1): weight (cout, cin, 1) -> (cout, cin).
    kw, kb = jax.random.split(key)
    bound = 1.0 / math.sqrt(cin)
    w = jax.random.uniform(kw, (cout, cin), jnp.float32, -bound, bound)
    b = jax.random.uniform(kb, (cout, 1), jnp.float32, -bound, bound)
    return w.astype(jnp.bfloat16), b


def _conv3_params(key, cin, cout):
    # PyTorch Conv1d(cin, cout, 3, dilation=d, padding=d): weight (cout, cin, 3).
    # Packed tap-major to (cout, 3*cin): Wd @ concat([x[t-d], x[t], x[t+d]]).
    kw, kb = jax.random.split(key)
    bound = 1.0 / math.sqrt(cin * 3)
    w = jax.random.uniform(kw, (cout, cin, 3), jnp.float32, -bound, bound)
    wd = jnp.transpose(w, (0, 2, 1)).reshape(cout, 3 * cin)
    b = jax.random.uniform(kb, (cout, 1), jnp.float32, -bound, bound)
    return wd.astype(jnp.bfloat16), b


def init_stage(key, num_layers, num_f_maps, dim, num_classes):
    keys = jax.random.split(key, 2 * num_layers + 2)
    w_in, b_in = _conv1x1_params(keys[0], dim, num_f_maps)
    wds, bds, w1s, b1s = [], [], [], []
    for i in range(num_layers):
        wd, bd = _conv3_params(keys[1 + 2 * i], num_f_maps, num_f_maps)
        w1, b1 = _conv1x1_params(keys[2 + 2 * i], num_f_maps, num_f_maps)
        wds.append(wd); bds.append(bd); w1s.append(w1); b1s.append(b1)
    w_out, b_out = _conv1x1_params(keys[-1], num_f_maps, num_classes)
    stage = dict(w_in=w_in, b_in=b_in, w_out=w_out, b_out=b_out)
    if num_layers > 0:
        # Stack per-layer weights -> far fewer kernel inputs / DMA descriptors.
        stage.update(wd=jnp.stack(wds), bd=jnp.stack(bds),
                     w1=jnp.stack(w1s), b1=jnp.stack(b1s))
    return stage


def init_params(key, p, num_preds=3):
    feature = p['feature']
    use_rgb = ('both' in feature) or ('rgb' in feature)
    use_flow = ('both' in feature) or ('flow' in feature)
    input_size = p['input_size'] * 2 if (use_rgb and use_flow) else p['input_size']
    stage_cfg = p['mstcn_stage_config']
    keys = jax.random.split(key, len(stage_cfg))
    stage1 = init_stage(keys[0], stage_cfg[0], p['hidden_size'], input_size, num_preds)
    stages = [init_stage(keys[1 + i], n, p['hidden_size'], num_preds, num_preds)
              for i, n in enumerate(stage_cfg[1:])]
    return dict(stage1=stage1, stages=stages, use_rgb=use_rgb, use_flow=use_flow)


# ----------------------------------------------------------------------------
# Forward pass: one fused pallas_call for the whole network
# ----------------------------------------------------------------------------

def mstcn_forward(params, rgb, flow):
    # Inputs stay (B, T, F) f32 in HBM: no wrapper-side concat or bf16 cast —
    # both are folded into the kernel's split-K stage-1 matmul.
    inputs = []
    if params['use_rgb']:
        inputs.append(rgb)
    if params['use_flow']:
        inputs.append(flow)
    n_inputs = len(inputs)
    B, T, _ = inputs[0].shape

    stage_params = [params['stage1']] + list(params['stages'])
    stage_layer_counts = tuple(
        (int(sp['wd'].shape[0]) if 'wd' in sp else 0) for sp in stage_params)
    num_stages = len(stage_params)
    hidden = stage_params[0]['w_in'].shape[0]
    num_classes = stage_params[-1]['w_out'].shape[0]

    # ---- flatten weights (stage-1 w_in split per input for in-kernel split-K)
    flat_w = []
    off = 0
    for x in inputs:
        f = x.shape[-1]
        flat_w.append(stage_params[0]['w_in'][:, off:off + f])
        off += f
    flat_w.append(stage_params[0]['b_in'])

    def _stage_tail(sp):
        tail = []
        if 'wd' in sp:
            tail += [sp['wd'], sp['bd'], sp['w1'], sp['b1']]
        tail += [sp['w_out'], sp['b_out']]
        return tail

    flat_w += _stage_tail(stage_params[0])
    for sp in stage_params[1:]:
        flat_w += [sp['w_in'], sp['b_in']]
        flat_w += _stage_tail(sp)

    in_specs = [pl.BlockSpec((1, T, x.shape[-1]), lambda b: (b, 0, 0))
                for x in inputs]
    # Weights: full-shape blocks, constant index maps (no re-DMA over batch).
    in_specs += [pl.BlockSpec(w.shape, lambda b, n=w.ndim: (0,) * n)
                 for w in flat_w]

    # ---- cost estimate: flops dominated by the stage-1 input conv, bytes by
    # the stage-1 input tensors.
    cin_total = sum(x.shape[-1] for x in inputs)
    flops = 2 * B * T * cin_total * hidden
    for s, nl in enumerate(stage_layer_counts):
        flops += nl * (2 * B * T * (3 * hidden) * hidden      # dilated conv
                       + 2 * B * T * hidden * hidden)         # 1x1 conv
        flops += 2 * B * T * hidden * num_classes             # output conv
        if s > 0:
            flops += 2 * B * T * num_classes * hidden         # stage input conv
    transcendentals = (num_stages - 1) * B * T * num_classes  # softmax exp
    bytes_accessed = (sum(int(x.size) * x.dtype.itemsize for x in inputs)
                      + sum(int(w.size) * w.dtype.itemsize for w in flat_w)
                      + num_stages * B * num_classes * T * 4)

    out = pl.pallas_call(
        functools.partial(_mstcn_kernel, stage_layer_counts, T, n_inputs),
        out_shape=jax.ShapeDtypeStruct((num_stages, B, num_classes, T),
                                       jnp.float32),
        grid=(B,),
        in_specs=in_specs,
        out_specs=pl.BlockSpec((num_stages, 1, num_classes, T),
                               lambda b: (0, b, 0, 0)),
        compiler_params=pltpu.CompilerParams(
            dimension_semantics=("parallel",),
            vmem_limit_bytes=64 * 1024 * 1024),
        cost_estimate=pl.CostEstimate(flops=int(flops),
                                      transcendentals=int(transcendentals),
                                      bytes_accessed=int(bytes_accessed)),
    )(*inputs, *flat_w)

    # Already (num_stages, B, num_classes, T) — matches the PyTorch module.
    return out


# ----------------------------------------------------------------------------

if __name__ == "__main__":
    p = dict(
        hidden_size=32,
        num_layers=3,          # read (unused) by the reference __init__
        len_sequence=16,       # read (unused) by the reference __init__
        mstcn_stage_config=[3, 2],
        feature='i3d_both',
        input_size=8,
        use_dropout=0.5,
    )
    B, T = 2, 16

    key = jax.random.PRNGKey(0)
    k_rgb, k_flow, k_params = jax.random.split(key, 3)
    rgb = jax.random.normal(k_rgb, (B, T, p['input_size']), jnp.float32)
    flow = jax.random.normal(k_flow, (B, T, p['input_size']), jnp.float32)

    params = init_params(k_params, p)
    logits = mstcn_forward(params, rgb, flow)
    jax.block_until_ready(logits)

    num_stages = len(p['mstcn_stage_config'])
    assert logits.shape == (num_stages, B, 3, T), logits.shape
    print("KERNEL_OK")
</pallas_src>

<mosaic_0001>
module attributes {stable_mosaic.version = 11 : i64} {
  func.func @_mstcn_kernel(%arg0: i32, %arg1: memref<1x16x8xf32, #tpu.memory_space<vmem>>, %arg2: memref<1x16x8xf32, #tpu.memory_space<vmem>>, %arg3: memref<32x8xbf16, #tpu.memory_space<vmem>>, %arg4: memref<32x8xbf16, #tpu.memory_space<vmem>>, %arg5: memref<32x1xf32, #tpu.memory_space<vmem>>, %arg6: memref<3x32x96xbf16, #tpu.memory_space<vmem>>, %arg7: memref<3x32x1xf32, #tpu.memory_space<vmem>>, %arg8: memref<3x32x32xbf16, #tpu.memory_space<vmem>>, %arg9: memref<3x32x1xf32, #tpu.memory_space<vmem>>, %arg10: memref<3x32xbf16, #tpu.memory_space<vmem>>, %arg11: memref<3x1xf32, #tpu.memory_space<vmem>>, %arg12: memref<32x3xbf16, #tpu.memory_space<vmem>>, %arg13: memref<32x1xf32, #tpu.memory_space<vmem>>, %arg14: memref<2x32x96xbf16, #tpu.memory_space<vmem>>, %arg15: memref<2x32x1xf32, #tpu.memory_space<vmem>>, %arg16: memref<2x32x32xbf16, #tpu.memory_space<vmem>>, %arg17: memref<2x32x1xf32, #tpu.memory_space<vmem>>, %arg18: memref<3x32xbf16, #tpu.memory_space<vmem>>, %arg19: memref<3x1xf32, #tpu.memory_space<vmem>>, %arg20: memref<2x1x3x16xf32, #tpu.memory_space<vmem>>) attributes {dimension_semantics = [#tpu.dimension_semantics<parallel>], iteration_bounds = array<i64: 2>, scalar_prefetch = 0 : i64, scratch_operands = 0 : i64, tpu.core_type = #tpu.core_type<tc>, window_params = [{transform_indices = @transform_0, window_bounds = array<i64: 1, 16, 8>}, {transform_indices = @transform_1, window_bounds = array<i64: 1, 16, 8>}, {pipeline_mode = #tpu.pipeline_mode<synchronous>, transform_indices = @transform_2, window_bounds = array<i64: 32, 8>}, {pipeline_mode = #tpu.pipeline_mode<synchronous>, transform_indices = @transform_3, window_bounds = array<i64: 32, 8>}, {pipeline_mode = #tpu.pipeline_mode<synchronous>, transform_indices = @transform_4, window_bounds = array<i64: 32, 1>}, {pipeline_mode = #tpu.pipeline_mode<synchronous>, transform_indices = @transform_5, window_bounds = array<i64: 3, 32, 96>}, {pipeline_mode = #tpu.pipeline_mode<synchronous>, transform_indices = @transform_6, window_bounds = array<i64: 3, 32, 1>}, {pipeline_mode = #tpu.pipeline_mode<synchronous>, transform_indices = @transform_7, window_bounds = array<i64: 3, 32, 32>}, {pipeline_mode = #tpu.pipeline_mode<synchronous>, transform_indices = @transform_8, window_bounds = array<i64: 3, 32, 1>}, {pipeline_mode = #tpu.pipeline_mode<synchronous>, transform_indices = @transform_9, window_bounds = array<i64: 3, 32>}, {pipeline_mode = #tpu.pipeline_mode<synchronous>, transform_indices = @transform_10, window_bounds = array<i64: 3, 1>}, {pipeline_mode = #tpu.pipeline_mode<synchronous>, transform_indices = @transform_11, window_bounds = array<i64: 32, 3>}, {pipeline_mode = #tpu.pipeline_mode<synchronous>, transform_indices = @transform_12, window_bounds = array<i64: 32, 1>}, {pipeline_mode = #tpu.pipeline_mode<synchronous>, transform_indices = @transform_13, window_bounds = array<i64: 2, 32, 96>}, {pipeline_mode = #tpu.pipeline_mode<synchronous>, transform_indices = @transform_14, window_bounds = array<i64: 2, 32, 1>}, {pipeline_mode = #tpu.pipeline_mode<synchronous>, transform_indices = @transform_15, window_bounds = array<i64: 2, 32, 32>}, {pipeline_mode = #tpu.pipeline_mode<synchronous>, transform_indices = @transform_16, window_bounds = array<i64: 2, 32, 1>}, {pipeline_mode = #tpu.pipeline_mode<synchronous>, transform_indices = @transform_17, window_bounds = array<i64: 3, 32>}, {pipeline_mode = #tpu.pipeline_mode<synchronous>, transform_indices = @transform_18, window_bounds = array<i64: 3, 1>}, {transform_indices = @transform_19, window_bounds = array<i64: 2, 1, 3, 16>}]} {
    %c0 = arith.constant 0 : index
    %c0_0 = arith.constant 0 : index
    %0 = vector.load %arg5[%c0, %c0_0] : memref<32x1xf32, #tpu.memory_space<vmem>>, vector<32x1xf32>
    %c0_1 = arith.constant 0 : index
    %c0_2 = arith.constant 0 : index
    %c0_3 = arith.constant 0 : index
    %1 = vector.load %arg1[%c0_1, %c0_2, %c0_3] : memref<1x16x8xf32, #tpu.memory_space<vmem>>, vector<1x16x8xf32>
    %2 = vector.shape_cast %1 : vector<1x16x8xf32> to vector<16x8xf32>
    %3 = arith.truncf %2 : vector<16x8xf32> to vector<16x8xbf16>
    %c0_4 = arith.constant 0 : index
    %c0_5 = arith.constant 0 : index
    %4 = vector.load %arg3[%c0_4, %c0_5] : memref<32x8xbf16, #tpu.memory_space<vmem>>, vector<32x8xbf16>
    %cst = arith.constant dense<0.000000e+00> : vector<32x16xf32>
    %5 = tpu.matmul %4, %3, %cst {dimension_numbers = #tpu.dot_dimension_numbers<[1], [1], [0], [0], [0, 0, 1, 0], [], []>} : vector<32x8xbf16>, vector<16x8xbf16>, vector<32x16xf32> -> vector<32x16xf32>
    %c0_6 = arith.constant 0 : index
    %c0_7 = arith.constant 0 : index
    %c0_8 = arith.constant 0 : index
    %6 = vector.load %arg2[%c0_6, %c0_7, %c0_8] : memref<1x16x8xf32, #tpu.memory_space<vmem>>, vector<1x16x8xf32>
    %7 = vector.shape_cast %6 : vector<1x16x8xf32> to vector<16x8xf32>
    %8 = arith.truncf %7 : vector<16x8xf32> to vector<16x8xbf16>
    %c0_9 = arith.constant 0 : index
    %c0_10 = arith.constant 0 : index
    %9 = vector.load %arg4[%c0_9, %c0_10] : memref<32x8xbf16, #tpu.memory_space<vmem>>, vector<32x8xbf16>
    %cst_11 = arith.constant dense<0.000000e+00> : vector<32x16xf32>
    %10 = tpu.matmul %9, %8, %cst_11 {dimension_numbers = #tpu.dot_dimension_numbers<[1], [1], [0], [0], [0, 0, 1, 0], [], []>} : vector<32x8xbf16>, vector<16x8xbf16>, vector<32x16xf32> -> vector<32x16xf32>
    %cst_12 = arith.constant 0.000000e+00 : f32
    %11 = vector.broadcast %cst_12 : f32 to vector<32x16xf32>
    %12 = arith.addf %11, %5 : vector<32x16xf32>
    %13 = arith.addf %12, %10 : vector<32x16xf32>
    %14 = vector.broadcast %0 : vector<32x1xf32> to vector<32x16xf32>
    %15 = arith.addf %13, %14 : vector<32x16xf32>
    %16 = arith.truncf %15 : vector<32x16xf32> to vector<32x16xbf16>
    %cst_13 = arith.constant 0.000000e+00 : bf16
    %17 = vector.broadcast %cst_13 : bf16 to vector<32x1xbf16>
    %18 = vector.extract_strided_slice %16 {offsets = [0, 0], sizes = [32, 15], strides = [1, 1]} : vector<32x16xbf16> to vector<32x15xbf16>
    %19 = tpu.concatenate %17, %18 in 1 : vector<32x1xbf16>, vector<32x15xbf16> -> vector<32x16xbf16>
    %20 = vector.extract_strided_slice %16 {offsets = [0, 1], sizes = [32, 15], strides = [1, 1]} : vector<32x16xbf16> to vector<32x15xbf16>
    %21 = tpu.concatenate %20, %17 in 1 : vector<32x15xbf16>, vector<32x1xbf16> -> vector<32x16xbf16>
    %22 = tpu.concatenate %19, %16, %21 in 0 : vector<32x16xbf16>, vector<32x16xbf16>, vector<32x16xbf16> -> vector<96x16xbf16>
    %c0_14 = arith.constant 0 : index
    %c0_15 = arith.constant 0 : index
    %c0_16 = arith.constant 0 : index
    %23 = vector.load %arg6[%c0_14, %c0_15, %c0_16] : memref<3x32x96xbf16, #tpu.memory_space<vmem>>, vector<1x32x96xbf16>
    %24 = vector.shape_cast %23 : vector<1x32x96xbf16> to vector<32x96xbf16>
    %c0_17 = arith.constant 0 : index
    %c0_18 = arith.constant 0 : index
    %c0_19 = arith.constant 0 : index
    %25 = vector.load %arg7[%c0_17, %c0_18, %c0_19] : memref<3x32x1xf32, #tpu.memory_space<vmem>>, vector<1x32x1xf32>
    %26 = vector.shape_cast %25 : vector<1x32x1xf32> to vector<32x1xf32>
    %cst_20 = arith.constant dense<0.000000e+00> : vector<32x16xf32>
    %27 = tpu.matmul %24, %22, %cst_20 {dimension_numbers = #tpu.dot_dimension_numbers<[1], [0], [0], [1], [0, 0, 1, 1], [], []>} : vector<32x96xbf16>, vector<96x16xbf16>, vector<32x16xf32> -> vector<32x16xf32>
    %28 = vector.broadcast %26 : vector<32x1xf32> to vector<32x16xf32>
    %29 = arith.addf %27, %28 : vector<32x16xf32>
    %cst_21 = arith.constant 0.000000e+00 : f32
    %30 = vector.broadcast %cst_21 : f32 to vector<32x16xf32>
    %31 = arith.maximumf %29, %30 : vector<32x16xf32>
    %c0_22 = arith.constant 0 : index
    %c0_23 = arith.constant 0 : index
    %c0_24 = arith.constant 0 : index
    %32 = vector.load %arg8[%c0_22, %c0_23, %c0_24] : memref<3x32x32xbf16, #tpu.memory_space<vmem>>, vector<1x32x32xbf16>
    %33 = vector.shape_cast %32 : vector<1x32x32xbf16> to vector<32x32xbf16>
    %c0_25 = arith.constant 0 : index
    %c0_26 = arith.constant 0 : index
    %c0_27 = arith.constant 0 : index
    %34 = vector.load %arg9[%c0_25, %c0_26, %c0_27] : memref<3x32x1xf32, #tpu.memory_space<vmem>>, vector<1x32x1xf32>
    %35 = vector.shape_cast %34 : vector<1x32x1xf32> to vector<32x1xf32>
    %36 = arith.truncf %31 : vector<32x16xf32> to vector<32x16xbf16>
    %cst_28 = arith.constant dense<0.000000e+00> : vector<32x16xf32>
    %37 = tpu.matmul %33, %36, %cst_28 {dimension_numbers = #tpu.dot_dimension_numbers<[1], [0], [0], [1], [0, 0, 1, 1], [], []>} : vector<32x32xbf16>, vector<32x16xbf16>, vector<32x16xf32> -> vector<32x16xf32>
    %38 = vector.broadcast %35 : vector<32x1xf32> to vector<32x16xf32>
    %39 = arith.addf %37, %38 : vector<32x16xf32>
    %40 = arith.addf %15, %39 : vector<32x16xf32>
    %41 = arith.truncf %40 : vector<32x16xf32> to vector<32x16xbf16>
    %cst_29 = arith.constant 0.000000e+00 : bf16
    %42 = vector.broadcast %cst_29 : bf16 to vector<32x2xbf16>
    %43 = vector.extract_strided_slice %41 {offsets = [0, 0], sizes = [32, 14], strides = [1, 1]} : vector<32x16xbf16> to vector<32x14xbf16>
    %44 = tpu.concatenate %42, %43 in 1 : vector<32x2xbf16>, vector<32x14xbf16> -> vector<32x16xbf16>
    %45 = vector.extract_strided_slice %41 {offsets = [0, 2], sizes = [32, 14], strides = [1, 1]} : vector<32x16xbf16> to vector<32x14xbf16>
    %46 = tpu.concatenate %45, %42 in 1 : vector<32x14xbf16>, vector<32x2xbf16> -> vector<32x16xbf16>
    %47 = tpu.concatenate %44, %41, %46 in 0 : vector<32x16xbf16>, vector<32x16xbf16>, vector<32x16xbf16> -> vector<96x16xbf16>
    %c1 = arith.constant 1 : index
    %c0_30 = arith.constant 0 : index
    %c0_31 = arith.constant 0 : index
    %48 = vector.load %arg6[%c1, %c0_30, %c0_31] : memref<3x32x96xbf16, #tpu.memory_space<vmem>>, vector<1x32x96xbf16>
    %49 = vector.shape_cast %48 : vector<1x32x96xbf16> to vector<32x96xbf16>
    %c1_32 = arith.constant 1 : index
    %c0_33 = arith.constant 0 : index
    %c0_34 = arith.constant 0 : index
    %50 = vector.load %arg7[%c1_32, %c0_33, %c0_34] : memref<3x32x1xf32, #tpu.memory_space<vmem>>, vector<1x32x1xf32>
    %51 = vector.shape_cast %50 : vector<1x32x1xf32> to vector<32x1xf32>
    %cst_35 = arith.constant dense<0.000000e+00> : vector<32x16xf32>
    %52 = tpu.matmul %49, %47, %cst_35 {dimension_numbers = #tpu.dot_dimension_numbers<[1], [0], [0], [1], [0, 0, 1, 1], [], []>} : vector<32x96xbf16>, vector<96x16xbf16>, vector<32x16xf32> -> vector<32x16xf32>
    %53 = vector.broadcast %51 : vector<32x1xf32> to vector<32x16xf32>
    %54 = arith.addf %52, %53 : vector<32x16xf32>
    %cst_36 = arith.constant 0.000000e+00 : f32
    %55 = vector.broadcast %cst_36 : f32 to vector<32x16xf32>
    %56 = arith.maximumf %54, %55 : vector<32x16xf32>
    %c1_37 = arith.constant 1 : index
    %c0_38 = arith.constant 0 : index
    %c0_39 = arith.constant 0 : index
    %57 = vector.load %arg8[%c1_37, %c0_38, %c0_39] : memref<3x32x32xbf16, #tpu.memory_space<vmem>>, vector<1x32x32xbf16>
    %58 = vector.shape_cast %57 : vector<1x32x32xbf16> to vector<32x32xbf16>
    %c1_40 = arith.constant 1 : index
    %c0_41 = arith.constant 0 : index
    %c0_42 = arith.constant 0 : index
    %59 = vector.load %arg9[%c1_40, %c0_41, %c0_42] : memref<3x32x1xf32, #tpu.memory_space<vmem>>, vector<1x32x1xf32>
    %60 = vector.shape_cast %59 : vector<1x32x1xf32> to vector<32x1xf32>
    %61 = arith.truncf %56 : vector<32x16xf32> to vector<32x16xbf16>
    %cst_43 = arith.constant dense<0.000000e+00> : vector<32x16xf32>
    %62 = tpu.matmul %58, %61, %cst_43 {dimension_numbers = #tpu.dot_dimension_numbers<[1], [0], [0], [1], [0, 0, 1, 1], [], []>} : vector<32x32xbf16>, vector<32x16xbf16>, vector<32x16xf32> -> vector<32x16xf32>
    %63 = vector.broadcast %60 : vector<32x1xf32> to vector<32x16xf32>
    %64 = arith.addf %62, %63 : vector<32x16xf32>
    %65 = arith.addf %40, %64 : vector<32x16xf32>
    %66 = arith.truncf %65 : vector<32x16xf32> to vector<32x16xbf16>
    %cst_44 = arith.constant 0.000000e+00 : bf16
    %67 = vector.broadcast %cst_44 : bf16 to vector<32x4xbf16>
    %68 = vector.extract_strided_slice %66 {offsets = [0, 0], sizes = [32, 12], strides = [1, 1]} : vector<32x16xbf16> to vector<32x12xbf16>
    %69 = tpu.concatenate %67, %68 in 1 : vector<32x4xbf16>, vector<32x12xbf16> -> vector<32x16xbf16>
    %70 = vector.extract_strided_slice %66 {offsets = [0, 4], sizes = [32, 12], strides = [1, 1]} : vector<32x16xbf16> to vector<32x12xbf16>
    %71 = tpu.concatenate %70, %67 in 1 : vector<32x12xbf16>, vector<32x4xbf16> -> vector<32x16xbf16>
    %72 = tpu.concatenate %69, %66, %71 in 0 : vector<32x16xbf16>, vector<32x16xbf16>, vector<32x16xbf16> -> vector<96x16xbf16>
    %c2 = arith.constant 2 : index
    %c0_45 = arith.constant 0 : index
    %c0_46 = arith.constant 0 : index
    %73 = vector.load %arg6[%c2, %c0_45, %c0_46] : memref<3x32x96xbf16, #tpu.memory_space<vmem>>, vector<1x32x96xbf16>
    %74 = vector.shape_cast %73 : vector<1x32x96xbf16> to vector<32x96xbf16>
    %c2_47 = arith.constant 2 : index
    %c0_48 = arith.constant 0 : index
    %c0_49 = arith.constant 0 : index
    %75 = vector.load %arg7[%c2_47, %c0_48, %c0_49] : memref<3x32x1xf32, #tpu.memory_space<vmem>>, vector<1x32x1xf32>
    %76 = vector.shape_cast %75 : vector<1x32x1xf32> to vector<32x1xf32>
    %cst_50 = arith.constant dense<0.000000e+00> : vector<32x16xf32>
    %77 = tpu.matmul %74, %72, %cst_50 {dimension_numbers = #tpu.dot_dimension_numbers<[1], [0], [0], [1], [0, 0, 1, 1], [], []>} : vector<32x96xbf16>, vector<96x16xbf16>, vector<32x16xf32> -> vector<32x16xf32>
    %78 = vector.broadcast %76 : vector<32x1xf32> to vector<32x16xf32>
    %79 = arith.addf %77, %78 : vector<32x16xf32>
    %cst_51 = arith.constant 0.000000e+00 : f32
    %80 = vector.broadcast %cst_51 : f32 to vector<32x16xf32>
    %81 = arith.maximumf %79, %80 : vector<32x16xf32>
    %c2_52 = arith.constant 2 : index
    %c0_53 = arith.constant 0 : index
    %c0_54 = arith.constant 0 : index
    %82 = vector.load %arg8[%c2_52, %c0_53, %c0_54] : memref<3x32x32xbf16, #tpu.memory_space<vmem>>, vector<1x32x32xbf16>
    %83 = vector.shape_cast %82 : vector<1x32x32xbf16> to vector<32x32xbf16>
    %c2_55 = arith.constant 2 : index
    %c0_56 = arith.constant 0 : index
    %c0_57 = arith.constant 0 : index
    %84 = vector.load %arg9[%c2_55, %c0_56, %c0_57] : memref<3x32x1xf32, #tpu.memory_space<vmem>>, vector<1x32x1xf32>
    %85 = vector.shape_cast %84 : vector<1x32x1xf32> to vector<32x1xf32>
    %86 = arith.truncf %81 : vector<32x16xf32> to vector<32x16xbf16>
    %cst_58 = arith.constant dense<0.000000e+00> : vector<32x16xf32>
    %87 = tpu.matmul %83, %86, %cst_58 {dimension_numbers = #tpu.dot_dimension_numbers<[1], [0], [0], [1], [0, 0, 1, 1], [], []>} : vector<32x32xbf16>, vector<32x16xbf16>, vector<32x16xf32> -> vector<32x16xf32>
    %88 = vector.broadcast %85 : vector<32x1xf32> to vector<32x16xf32>
    %89 = arith.addf %87, %88 : vector<32x16xf32>
    %90 = arith.addf %65, %89 : vector<32x16xf32>
    %c0_59 = arith.constant 0 : index
    %c0_60 = arith.constant 0 : index
    %91 = vector.load %arg10[%c0_59, %c0_60] : memref<3x32xbf16, #tpu.memory_space<vmem>>, vector<3x32xbf16>
    %c0_61 = arith.constant 0 : index
    %c0_62 = arith.constant 0 : index
    %92 = vector.load %arg11[%c0_61, %c0_62] : memref<3x1xf32, #tpu.memory_space<vmem>>, vector<3x1xf32>
    %93 = arith.truncf %90 : vector<32x16xf32> to vector<32x16xbf16>
    %cst_63 = arith.constant dense<0.000000e+00> : vector<3x16xf32>
    %94 = tpu.matmul %91, %93, %cst_63 {dimension_numbers = #tpu.dot_dimension_numbers<[1], [0], [0], [1], [0, 0, 1, 1], [], []>} : vector<3x32xbf16>, vector<32x16xbf16>, vector<3x16xf32> -> vector<3x16xf32>
    %95 = vector.broadcast %92 : vector<3x1xf32> to vector<3x16xf32>
    %96 = arith.addf %94, %95 : vector<3x16xf32>
    %c0_64 = arith.constant 0 : index
    %c0_65 = arith.constant 0 : index
    %c0_66 = arith.constant 0 : index
    %c0_67 = arith.constant 0 : index
    %97 = vector.load %arg20[%c0_64, %c0_65, %c0_66, %c0_67] : memref<2x1x3x16xf32, #tpu.memory_space<vmem>>, vector<1x1x3x16xf32>
    %98 = vector.shape_cast %97 : vector<1x1x3x16xf32> to vector<3x16xf32>
    %99 = vector.shape_cast %96 : vector<3x16xf32> to vector<1x1x3x16xf32>
    tpu.vector_store %arg20[%c0_64, %c0_65, %c0_66, %c0_67], %99 {strides = array<i32>} : memref<2x1x3x16xf32, #tpu.memory_space<vmem>>, vector<1x1x3x16xf32>,
    %cst_68 = arith.constant dense<0xFF800000> : vector<16xf32>
    %100 = vector.multi_reduction <maximumf>, %96, %cst_68 [0] : vector<3x16xf32> to vector<16xf32>
    %101 = vector.shape_cast %100 : vector<16xf32> to vector<1x16xf32>
    %102 = vector.broadcast %101 : vector<1x16xf32> to vector<3x16xf32>
    %103 = arith.subf %96, %102 : vector<3x16xf32>
    %104 = math.exp %103 : vector<3x16xf32>
    %cst_69 = arith.constant dense<0.000000e+00> : vector<16xf32>
    %105 = vector.multi_reduction <add>, %104, %cst_69 [0] : vector<3x16xf32> to vector<16xf32>
    %106 = vector.shape_cast %105 : vector<16xf32> to vector<1x16xf32>
    %107 = vector.broadcast %106 : vector<1x16xf32> to vector<3x16xf32>
    %108 = arith.divf %104, %107 : vector<3x16xf32>
    %c0_70 = arith.constant 0 : index
    %c0_71 = arith.constant 0 : index
    %109 = vector.load %arg12[%c0_70, %c0_71] : memref<32x3xbf16, #tpu.memory_space<vmem>>, vector<32x3xbf16>
    %c0_72 = arith.constant 0 : index
    %c0_73 = arith.constant 0 : index
    %110 = vector.load %arg13[%c0_72, %c0_73] : memref<32x1xf32, #tpu.memory_space<vmem>>, vector<32x1xf32>
    %111 = arith.truncf %108 : vector<3x16xf32> to vector<3x16xbf16>
    %cst_74 = arith.constant dense<0.000000e+00> : vector<32x16xf32>
    %112 = tpu.matmul %109, %111, %cst_74 {dimension_numbers = #tpu.dot_dimension_numbers<[1], [0], [0], [1], [0, 0, 1, 1], [], []>} : vector<32x3xbf16>, vector<3x16xbf16>, vector<32x16xf32> -> vector<32x16xf32>
    %113 = vector.broadcast %110 : vector<32x1xf32> to vector<32x16xf32>
    %114 = arith.addf %112, %113 : vector<32x16xf32>
    %115 = arith.truncf %114 : vector<32x16xf32> to vector<32x16xbf16>
    %cst_75 = arith.constant 0.000000e+00 : bf16
    %116 = vector.broadcast %cst_75 : bf16 to vector<32x1xbf16>
    %117 = vector.extract_strided_slice %115 {offsets = [0, 0], sizes = [32, 15], strides = [1, 1]} : vector<32x16xbf16> to vector<32x15xbf16>
    %118 = tpu.concatenate %116, %117 in 1 : vector<32x1xbf16>, vector<32x15xbf16> -> vector<32x16xbf16>
    %119 = vector.extract_strided_slice %115 {offsets = [0, 1], sizes = [32, 15], strides = [1, 1]} : vector<32x16xbf16> to vector<32x15xbf16>
    %120 = tpu.concatenate %119, %116 in 1 : vector<32x15xbf16>, vector<32x1xbf16> -> vector<32x16xbf16>
    %121 = tpu.concatenate %118, %115, %120 in 0 : vector<32x16xbf16>, vector<32x16xbf16>, vector<32x16xbf16> -> vector<96x16xbf16>
    %c0_76 = arith.constant 0 : index
    %c0_77 = arith.constant 0 : index
    %c0_78 = arith.constant 0 : index
    %122 = vector.load %arg14[%c0_76, %c0_77, %c0_78] : memref<2x32x96xbf16, #tpu.memory_space<vmem>>, vector<1x32x96xbf16>
    %123 = vector.shape_cast %122 : vector<1x32x96xbf16> to vector<32x96xbf16>
    %c0_79 = arith.constant 0 : index
    %c0_80 = arith.constant 0 : index
    %c0_81 = arith.constant 0 : index
    %124 = vector.load %arg15[%c0_79, %c0_80, %c0_81] : memref<2x32x1xf32, #tpu.memory_space<vmem>>, vector<1x32x1xf32>
    %125 = vector.shape_cast %124 : vector<1x32x1xf32> to vector<32x1xf32>
    %cst_82 = arith.constant dense<0.000000e+00> : vector<32x16xf32>
    %126 = tpu.matmul %123, %121, %cst_82 {dimension_numbers = #tpu.dot_dimension_numbers<[1], [0], [0], [1], [0, 0, 1, 1], [], []>} : vector<32x96xbf16>, vector<96x16xbf16>, vector<32x16xf32> -> vector<32x16xf32>
    %127 = vector.broadcast %125 : vector<32x1xf32> to vector<32x16xf32>
    %128 = arith.addf %126, %127 : vector<32x16xf32>
    %cst_83 = arith.constant 0.000000e+00 : f32
    %129 = vector.broadcast %cst_83 : f32 to vector<32x16xf32>
    %130 = arith.maximumf %128, %129 : vector<32x16xf32>
    %c0_84 = arith.constant 0 : index
    %c0_85 = arith.constant 0 : index
    %c0_86 = arith.constant 0 : index
    %131 = vector.load %arg16[%c0_84, %c0_85, %c0_86] : memref<2x32x32xbf16, #tpu.memory_space<vmem>>, vector<1x32x32xbf16>
    %132 = vector.shape_cast %131 : vector<1x32x32xbf16> to vector<32x32xbf16>
    %c0_87 = arith.constant 0 : index
    %c0_88 = arith.constant 0 : index
    %c0_89 = arith.constant 0 : index
    %133 = vector.load %arg17[%c0_87, %c0_88, %c0_89] : memref<2x32x1xf32, #tpu.memory_space<vmem>>, vector<1x32x1xf32>
    %134 = vector.shape_cast %133 : vector<1x32x1xf32> to vector<32x1xf32>
    %135 = arith.truncf %130 : vector<32x16xf32> to vector<32x16xbf16>
    %cst_90 = arith.constant dense<0.000000e+00> : vector<32x16xf32>
    %136 = tpu.matmul %132, %135, %cst_90 {dimension_numbers = #tpu.dot_dimension_numbers<[1], [0], [0], [1], [0, 0, 1, 1], [], []>} : vector<32x32xbf16>, vector<32x16xbf16>, vector<32x16xf32> -> vector<32x16xf32>
    %137 = vector.broadcast %134 : vector<32x1xf32> to vector<32x16xf32>
    %138 = arith.addf %136, %137 : vector<32x16xf32>
    %139 = arith.addf %114, %138 : vector<32x16xf32>
    %140 = arith.truncf %139 : vector<32x16xf32> to vector<32x16xbf16>
    %cst_91 = arith.constant 0.000000e+00 : bf16
    %141 = vector.broadcast %cst_91 : bf16 to vector<32x2xbf16>
    %142 = vector.extract_strided_slice %140 {offsets = [0, 0], sizes = [32, 14], strides = [1, 1]} : vector<32x16xbf16> to vector<32x14xbf16>
    %143 = tpu.concatenate %141, %142 in 1 : vector<32x2xbf16>, vector<32x14xbf16> -> vector<32x16xbf16>
    %144 = vector.extract_strided_slice %140 {offsets = [0, 2], sizes = [32, 14], strides = [1, 1]} : vector<32x16xbf16> to vector<32x14xbf16>
    %145 = tpu.concatenate %144, %141 in 1 : vector<32x14xbf16>, vector<32x2xbf16> -> vector<32x16xbf16>
    %146 = tpu.concatenate %143, %140, %145 in 0 : vector<32x16xbf16>, vector<32x16xbf16>, vector<32x16xbf16> -> vector<96x16xbf16>
    %c1_92 = arith.constant 1 : index
    %c0_93 = arith.constant 0 : index
    %c0_94 = arith.constant 0 : index
    %147 = vector.load %arg14[%c1_92, %c0_93, %c0_94] : memref<2x32x96xbf16, #tpu.memory_space<vmem>>, vector<1x32x96xbf16>
    %148 = vector.shape_cast %147 : vector<1x32x96xbf16> to vector<32x96xbf16>
    %c1_95 = arith.constant 1 : index
    %c0_96 = arith.constant 0 : index
    %c0_97 = arith.constant 0 : index
    %149 = vector.load %arg15[%c1_95, %c0_96, %c0_97] : memref<2x32x1xf32, #tpu.memory_space<vmem>>, vector<1x32x1xf32>
    %150 = vector.shape_cast %149 : vector<1x32x1xf32> to vector<32x1xf32>
    %cst_98 = arith.constant dense<0.000000e+00> : vector<32x16xf32>
    %151 = tpu.matmul %148, %146, %cst_98 {dimension_numbers = #tpu.dot_dimension_numbers<[1], [0], [0], [1], [0, 0, 1, 1], [], []>} : vector<32x96xbf16>, vector<96x16xbf16>, vector<32x16xf32> -> vector<32x16xf32>
    %152 = vector.broadcast %150 : vector<32x1xf32> to vector<32x16xf32>
    %153 = arith.addf %151, %152 : vector<32x16xf32>
    %cst_99 = arith.constant 0.000000e+00 : f32
    %154 = vector.broadcast %cst_99 : f32 to vector<32x16xf32>
    %155 = arith.maximumf %153, %154 : vector<32x16xf32>
    %c1_100 = arith.constant 1 : index
    %c0_101 = arith.constant 0 : index
    %c0_102 = arith.constant 0 : index
    %156 = vector.load %arg16[%c1_100, %c0_101, %c0_102] : memref<2x32x32xbf16, #tpu.memory_space<vmem>>, vector<1x32x32xbf16>
    %157 = vector.shape_cast %156 : vector<1x32x32xbf16> to vector<32x32xbf16>
    %c1_103 = arith.constant 1 : index
    %c0_104 = arith.constant 0 : index
    %c0_105 = arith.constant 0 : index
    %158 = vector.load %arg17[%c1_103, %c0_104, %c0_105] : memref<2x32x1xf32, #tpu.memory_space<vmem>>, vector<1x32x1xf32>
    %159 = vector.shape_cast %158 : vector<1x32x1xf32> to vector<32x1xf32>
    %160 = arith.truncf %155 : vector<32x16xf32> to vector<32x16xbf16>
    %cst_106 = arith.constant dense<0.000000e+00> : vector<32x16xf32>
    %161 = tpu.matmul %157, %160, %cst_106 {dimension_numbers = #tpu.dot_dimension_numbers<[1], [0], [0], [1], [0, 0, 1, 1], [], []>} : vector<32x32xbf16>, vector<32x16xbf16>, vector<32x16xf32> -> vector<32x16xf32>
    %162 = vector.broadcast %159 : vector<32x1xf32> to vector<32x16xf32>
    %163 = arith.addf %161, %162 : vector<32x16xf32>
    %164 = arith.addf %139, %163 : vector<32x16xf32>
    %c0_107 = arith.constant 0 : index
    %c0_108 = arith.constant 0 : index
    %165 = vector.load %arg18[%c0_107, %c0_108] : memref<3x32xbf16, #tpu.memory_space<vmem>>, vector<3x32xbf16>
    %c0_109 = arith.constant 0 : index
    %c0_110 = arith.constant 0 : index
    %166 = vector.load %arg19[%c0_109, %c0_110] : memref<3x1xf32, #tpu.memory_space<vmem>>, vector<3x1xf32>
    %167 = arith.truncf %164 : vector<32x16xf32> to vector<32x16xbf16>
    %cst_111 = arith.constant dense<0.000000e+00> : vector<3x16xf32>
    %168 = tpu.matmul %165, %167, %cst_111 {dimension_numbers = #tpu.dot_dimension_numbers<[1], [0], [0], [1], [0, 0, 1, 1], [], []>} : vector<3x32xbf16>, vector<32x16xbf16>, vector<3x16xf32> -> vector<3x16xf32>
    %169 = vector.broadcast %166 : vector<3x1xf32> to vector<3x16xf32>
    %170 = arith.addf %168, %169 : vector<3x16xf32>
    %c1_112 = arith.constant 1 : index
    %c0_113 = arith.constant 0 : index
    %c0_114 = arith.constant 0 : index
    %c0_115 = arith.constant 0 : index
    %171 = vector.load %arg20[%c1_112, %c0_113, %c0_114, %c0_115] : memref<2x1x3x16xf32, #tpu.memory_space<vmem>>, vector<1x1x3x16xf32>
    %172 = vector.shape_cast %171 : vector<1x1x3x16xf32> to vector<3x16xf32>
    %173 = vector.shape_cast %170 : vector<3x16xf32> to vector<1x1x3x16xf32>
    tpu.vector_store %arg20[%c1_112, %c0_113, %c0_114, %c0_115], %173 {strides = array<i32>} : memref<2x1x3x16xf32, #tpu.memory_space<vmem>>, vector<1x1x3x16xf32>,
    return
  }
  func.func @transform_0(%arg0: i32) -> (i32, i32, i32) {
    %c0_i32 = arith.constant 0 : i32
    %c0_i32_0 = arith.constant 0 : i32
    %c0_i32_1 = arith.constant 0 : i32
    return %arg0, %c0_i32, %c0_i32_0 : i32, i32, i32
  }
  func.func @transform_1(%arg0: i32) -> (i32, i32, i32) {
    %c0_i32 = arith.constant 0 : i32
    %c0_i32_0 = arith.constant 0 : i32
    %c0_i32_1 = arith.constant 0 : i32
    return %arg0, %c0_i32, %c0_i32_0 : i32, i32, i32
  }
  func.func @transform_2(%arg0: i32) -> (i32, i32) {
    %c0_i32 = arith.constant 0 : i32
    %c0_i32_0 = arith.constant 0 : i32
    %c0_i32_1 = arith.constant 0 : i32
    return %c0_i32, %c0_i32_0 : i32, i32
  }
  func.func @transform_3(%arg0: i32) -> (i32, i32) {
    %c0_i32 = arith.constant 0 : i32
    %c0_i32_0 = arith.constant 0 : i32
    %c0_i32_1 = arith.constant 0 : i32
    return %c0_i32, %c0_i32_0 : i32, i32
  }
  func.func @transform_4(%arg0: i32) -> (i32, i32) {
    %c0_i32 = arith.constant 0 : i32
    %c0_i32_0 = arith.constant 0 : i32
    %c0_i32_1 = arith.constant 0 : i32
    return %c0_i32, %c0_i32_0 : i32, i32
  }
  func.func @transform_5(%arg0: i32) -> (i32, i32, i32) {
    %c0_i32 = arith.constant 0 : i32
    %c0_i32_0 = arith.constant 0 : i32
    %c0_i32_1 = arith.constant 0 : i32
    %c0_i32_2 = arith.constant 0 : i32
    return %c0_i32, %c0_i32_0, %c0_i32_1 : i32, i32, i32
  }
  func.func @transform_6(%arg0: i32) -> (i32, i32, i32) {
    %c0_i32 = arith.constant 0 : i32
    %c0_i32_0 = arith.constant 0 : i32
    %c0_i32_1 = arith.constant 0 : i32
    %c0_i32_2 = arith.constant 0 : i32
    return %c0_i32, %c0_i32_0, %c0_i32_1 : i32, i32, i32
  }
  func.func @transform_7(%arg0: i32) -> (i32, i32, i32) {
    %c0_i32 = arith.constant 0 : i32
    %c0_i32_0 = arith.constant 0 : i32
    %c0_i32_1 = arith.constant 0 : i32
    %c0_i32_2 = arith.constant 0 : i32
    return %c0_i32, %c0_i32_0, %c0_i32_1 : i32, i32, i32
  }
  func.func @transform_8(%arg0: i32) -> (i32, i32, i32) {
    %c0_i32 = arith.constant 0 : i32
    %c0_i32_0 = arith.constant 0 : i32
    %c0_i32_1 = arith.constant 0 : i32
    %c0_i32_2 = arith.constant 0 : i32
    return %c0_i32, %c0_i32_0, %c0_i32_1 : i32, i32, i32
  }
  func.func @transform_9(%arg0: i32) -> (i32, i32) {
    %c0_i32 = arith.constant 0 : i32
    %c0_i32_0 = arith.constant 0 : i32
    %c0_i32_1 = arith.constant 0 : i32
    return %c0_i32, %c0_i32_0 : i32, i32
  }
  func.func @transform_10(%arg0: i32) -> (i32, i32) {
    %c0_i32 = arith.constant 0 : i32
    %c0_i32_0 = arith.constant 0 : i32
    %c0_i32_1 = arith.constant 0 : i32
    return %c0_i32, %c0_i32_0 : i32, i32
  }
  func.func @transform_11(%arg0: i32) -> (i32, i32) {
    %c0_i32 = arith.constant 0 : i32
    %c0_i32_0 = arith.constant 0 : i32
    %c0_i32_1 = arith.constant 0 : i32
    return %c0_i32, %c0_i32_0 : i32, i32
  }
  func.func @transform_12(%arg0: i32) -> (i32, i32) {
    %c0_i32 = arith.constant 0 : i32
    %c0_i32_0 = arith.constant 0 : i32
    %c0_i32_1 = arith.constant 0 : i32
    return %c0_i32, %c0_i32_0 : i32, i32
  }
  func.func @transform_13(%arg0: i32) -> (i32, i32, i32) {
    %c0_i32 = arith.constant 0 : i32
    %c0_i32_0 = arith.constant 0 : i32
    %c0_i32_1 = arith.constant 0 : i32
    %c0_i32_2 = arith.constant 0 : i32
    return %c0_i32, %c0_i32_0, %c0_i32_1 : i32, i32, i32
  }
  func.func @transform_14(%arg0: i32) -> (i32, i32, i32) {
    %c0_i32 = arith.constant 0 : i32
    %c0_i32_0 = arith.constant 0 : i32
    %c0_i32_1 = arith.constant 0 : i32
    %c0_i32_2 = arith.constant 0 : i32
    return %c0_i32, %c0_i32_0, %c0_i32_1 : i32, i32, i32
  }
  func.func @transform_15(%arg0: i32) -> (i32, i32, i32) {
    %c0_i32 = arith.constant 0 : i32
    %c0_i32_0 = arith.constant 0 : i32
    %c0_i32_1 = arith.constant 0 : i32
    %c0_i32_2 = arith.constant 0 : i32
    return %c0_i32, %c0_i32_0, %c0_i32_1 : i32, i32, i32
  }
  func.func @transform_16(%arg0: i32) -> (i32, i32, i32) {
    %c0_i32 = arith.constant 0 : i32
    %c0_i32_0 = arith.constant 0 : i32
    %c0_i32_1 = arith.constant 0 : i32
    %c0_i32_2 = arith.constant 0 : i32
    return %c0_i32, %c0_i32_0, %c0_i32_1 : i32, i32, i32
  }
  func.func @transform_17(%arg0: i32) -> (i32, i32) {
    %c0_i32 = arith.constant 0 : i32
    %c0_i32_0 = arith.constant 0 : i32
    %c0_i32_1 = arith.constant 0 : i32
    return %c0_i32, %c0_i32_0 : i32, i32
  }
  func.func @transform_18(%arg0: i32) -> (i32, i32) {
    %c0_i32 = arith.constant 0 : i32
    %c0_i32_0 = arith.constant 0 : i32
    %c0_i32_1 = arith.constant 0 : i32
    return %c0_i32, %c0_i32_0 : i32, i32
  }
  func.func @transform_19(%arg0: i32) -> (i32, i32, i32, i32) {
    %c0_i32 = arith.constant 0 : i32
    %c0_i32_0 = arith.constant 0 : i32
    %c0_i32_1 = arith.constant 0 : i32
    %c0_i32_2 = arith.constant 0 : i32
    return %c0_i32, %arg0, %c0_i32_0, %c0_i32_1 : i32, i32, i32, i32
  }
}

</mosaic_0001>

<bundles_post_ra>
// kernel: tpu_custom_call.1
= control target key start
LH: loop header
LB: loop body
LE: loop exit
PB: predicated region body
PF: predicated region fallthrough
CT: control target
= control target key end

     0   :  { %s4981_s0 = inlined_call_operand.hbm [shape: f32[2,16,8], index: 0, kind: input, shape index: {}]   ;;  %s4982_s1 = inlined_call_operand.hbm [shape: f32[2,16,8], index: 1, kind: input, shape index: {}]   ;;  %s4983_s2 = inlined_call_operand.hbm [shape: bf16[32,8], index: 2, kind: input, shape index: {}]   ;;  %s4984_s3 = inlined_call_operand.hbm [shape: bf16[32,8], index: 3, kind: input, shape index: {}]   ;;  %s4985_s4 = inlined_call_operand.hbm [shape: f32[32,1], index: 4, kind: input, shape index: {}]   ;;  %s4986_s5 = inlined_call_operand.hbm [shape: bf16[3,32,96], index: 5, kind: input, shape index: {}]   ;;  %s4987_s6 = inlined_call_operand.hbm [shape: f32[3,32,1], index: 6, kind: input, shape index: {}]   ;;  %s4988_s7 = inlined_call_operand.hbm [shape: bf16[3,32,32], index: 7, kind: input, shape index: {}]   ;;  %s4989_s8 = inlined_call_operand.hbm [shape: f32[3,32,1], index: 8, kind: input, shape index: {}]   ;;  %s4990_s9 = inlined_call_operand.hbm [shape: bf16[3,32], index: 9, kind: input, shape index: {}]   ;;  %s4991_s10 = inlined_call_operand.hbm [shape: f32[3,1], index: 10, kind: input, shape index: {}]   ;;  %s4992_s11 = inlined_call_operand.hbm [shape: bf16[32,3], index: 11, kind: input, shape index: {}]   ;;  %s4993_s12 = inlined_call_operand.hbm [shape: f32[32,1], index: 12, kind: input, shape index: {}]   ;;  %s4994_s13 = inlined_call_operand.hbm [shape: bf16[2,32,96], index: 13, kind: input, shape index: {}]   ;;  %s4995_s14 = inlined_call_operand.hbm [shape: f32[2,32,1], index: 14, kind: input, shape index: {}]   ;;  %s4996_s15 = inlined_call_operand.hbm [shape: bf16[2,32,32], index: 15, kind: input, shape index: {}]   ;;  %s4997_s16 = inlined_call_operand.hbm [shape: f32[2,32,1], index: 16, kind: input, shape index: {}]   ;;  %s4998_s17 = inlined_call_operand.hbm [shape: bf16[3,32], index: 17, kind: input, shape index: {}]   ;;  %s4999_s18 = inlined_call_operand.hbm [shape: f32[3,1], index: 18, kind: input, shape index: {}]   ;;  %s5000_s19 = inlined_call_operand.hbm [shape: f32[2,2,3,16], index: 19, kind: output, shape index: {}]  }
   0x1   :  { %5026 = sst [smem:[#allocation51_spill]] %s4981_s0 }
   0x2   :  { %5027 = sst [smem:[#allocation52_spill]] %s4982_s1 }
   0x3   :  { %5028 = sst [smem:[#allocation53_spill]] %s4983_s2 }
   0x4   :  { %5029 = sst [smem:[#allocation54_spill]] %s4984_s3 }
   0x5   :  { %5030 = sst [smem:[#allocation55_spill]] %s4985_s4 }
   0x6   :  { %5031 = sst [smem:[#allocation56_spill]] %s4986_s5 }
   0x7   :  { %5032 = sst [smem:[#allocation57_spill]] %s4987_s6 }
   0x8   :  { %5033 = sst [smem:[#allocation58_spill]] %s4988_s7 }
   0x9   :  { %5034 = sst [smem:[#allocation59_spill]] %s4989_s8 }
   0xa   :  { %5035 = sst [smem:[#allocation60_spill]] %s4990_s9 }
   0xb   :  { %5036 = sst [smem:[#allocation61_spill]] %s4991_s10 }
   0xc   :  { %5037 = sst [smem:[#allocation62_spill]] %s4992_s11 }
   0xd   :  { %5038 = sst [smem:[#allocation63_spill]] %s4993_s12 }
   0xe   :  { %5039 = sst [smem:[#allocation64_spill]] %s4994_s13 }
   0xf   :  { %5040 = sst [smem:[#allocation65_spill]] %s4995_s14 }
  0x10   :  { %5041 = sst [smem:[#allocation66_spill]] %s4997_s16 }
  0x11   :  { %5042 = sst [smem:[#allocation67_spill]] %s4999_s18 }
  0x12   :  { %5043 = sst [smem:[#allocation68_spill]] %s5000_s19 }
  0x13   :  { %24 = vsyncpa [#allocation3], 0 }
  0x14   :  { %26 = vsyncpa [#allocation3 + $0x1], 0 }
  0x15   :  { %27 = vsyncpa [#allocation6], 0 }
  0x16   :  { %29 = vsyncpa [#allocation6 + $0x1], 0 }
  0x17   :  { %30 = vsyncpa [#allocation9], 0 }
  0x18   :  { %31 = vsyncpa [#allocation12], 0 }
  0x19   :  { %32 = vsyncpa [#allocation15], 0 }
  0x1a   :  { %33 = vsyncpa [#allocation18], 0 }
  0x1b   :  { %34 = vsyncpa [#allocation21], 0 }
  0x1c   :  { %35 = vsyncpa [#allocation24], 0 }
  0x1d   :  { %36 = vsyncpa [#allocation27], 0 }
  0x1e   :  { %37 = vsyncpa [#allocation30], 0 }
  0x1f   :  { %38 = vsyncpa [#allocation4], 0 }
  0x20   :  { %40 = vsyncpa [#allocation4 + $0x1], 0  ;;  %s4122_s0 = smov 0   ;;  %s4124_s30 = smov 0  }
  0x21   :  { %s4126_s20 = smov 0   ;;  %s4128_s21 = smov 0  }
  0x22 LB: > { %5044 = sst [smem:[#allocation45_spill]] %s3972_s0  ;;  %s3986_s1 = smov [#allocation7]   ;;  %s3984_s21 = sphi %s4128_s21, %s4556_s21   ;;  %s3980_s20 = sphi %s4126_s20, %s5118_s20   ;;  %s3976_s30 = sphi %s4124_s30, %s5117_s30   ;;  %s3972_s0 = sphi %s4122_s0, %s5116_s0  }
  0x23   : > { %5045 = sst [smem:[#allocation46_spill]] %s3976_s30  ;;  %s498_s22 = sshll.u32 %s3986_s1, 4  ;;  %s4148_s22 = int_to_ptr.vmem [resolvable:$true] %s498_s22 }
  0x24   : > { %5046 = sst [smem:[#allocation47_spill]] %s3980_s20  ;;  %s4143_s2 = sadd.s32 4294967295, %s3984_s21  }
  0x25   : > { %5047 = sst [smem:[#allocation48_spill]] %s3984_s21  ;;  %p2700_p0 = scmp.ge.s32.totalorder %s3984_s21, 1 }
  0x26   : > { %5048 = sst [smem:[#allocation49_spill]] %s4143_s2  ;;  %p5017_p1 = scmp.eq.s32.totalorder %s4143_s2, 0 }
  0x27   : > { %p486_p2 = scmp.lt.s32.totalorder %s3984_s21, 3  ;;  %s3987_s24 = smov [#allocation8]  }
  0x28   : > { %s511_s25 = sshll.u32 %s3987_s24, 4  ;;  %s3988_s26 = smov [#allocation11]   ;;  %s4163_s25 = int_to_ptr.vmem [resolvable:$true] %s511_s25 }
  0x29   : > { %p4150_p3 = pnand %p2700_p0, %p486_p2  ;;  %s537_s27 = sshll.u32 %s3988_s26, 4  ;;  %s4165_s27 = int_to_ptr.vmem [resolvable:$true] %s537_s27 }
  0x2a   : > { %s5052_s1 = sld [smem:[#allocation53_spill]] }
  0x2b   : > { %s5049_s23 = scalar_select %p4150_p3, 1, 0 }
  0x2c   : > { %p3146_p5 = pneg %p4150_p3 }
  0x2d   : > { %5050 = sst [smem:[#allocation50_spill]] %s5049_s23 }
  0x2e   : > { %p4159_p6 = pnand %p3146_p5, %p5017_p1 }
  0x30   : > { %s3342_s19 = scalar_lea.hbm %s5052_s1, 256  ;;  %p4175_p8 = pneg %p4159_p6 }
  0x31   : > { %p3343_p7 = scmp.ne.s32.totalorder %s5052_s1, %s3342_s19  ;;  %p3349_p11 = scmp.lt.u32.totalorder %s3342_s19, %s5052_s1 }
  0x33   : > { %p3345_p9 = pnand %p4175_p8, %p3343_p7 }
  0x35   : > { %p3346_p10 = pneg %p3345_p9 }
  0x37   : > { %p3351_p12 = pnand %p3349_p11, %p3346_p10 }
  0x39   : > { %3354 = shalt.err (!%p3351_p12)
}
  0x3a   : > { %s3355_s0 = scalar_lea.vmem %s4148_s22, 256  ;;  %p3363_p5 = scmp.lt.s32.totalorder %s4148_s22, %s4148_s22 }
  0x3b   : > { %p3356_p13 = scmp.ne.s32.totalorder %s4148_s22, %s3355_s0  ;;  %p3364_p4 = scmp.lt.s32.totalorder %s3355_s0, %s3355_s0 }
  0x3d   : > { %p3358_p0 = pnand %p3356_p13, %p4175_p8  ;;  %p3365_p7 = por %p3364_p4, %p3363_p5 }
  0x3f   : > { %p3359_p2 = pneg %p3358_p0 }
  0x41   : > { %p3366_p9 = pnand %p3365_p7, %p3359_p2 }
  0x43   : > { %3369 = shalt.err (!%p3366_p9)
}
  0x44   : > { %s3989_s23 = smov 64   ;;  %s3990_s19 = smov 4  }
  0x45   : > { %3149 = dma.hbm_to_vmem [thread:$0]  (!%p4159_p6), %s5052_s1, 256, %s4148_s22, [#allocation6], %s3989_s23, %s3989_s23, %s3990_s19  }
  0x46   : > { %s5054_s30 = sld [smem:[#allocation54_spill]] }
  0x4c   : > { %s5055_s18 = smov %s5054_s30  ;;  %s3370_s0 = scalar_lea.hbm %s5054_s30, 256 }
  0x4d   : > { %p3371_p4 = scmp.ne.s32.totalorder %s5055_s18, %s3370_s0  ;;  %p3377_p12 = scmp.lt.u32.totalorder %s3370_s0, %s5055_s18 }
  0x4f   : > { %p3373_p10 = pnand %p3371_p4, %p4175_p8 }
  0x51   : > { %p3374_p11 = pneg %p3373_p10 }
  0x53   : > { %p3379_p13 = pnand %p3377_p12, %p3374_p11 }
  0x55   : > { %3382 = shalt.err (!%p3379_p13)
}
  0x56   : > { %s3383_s22 = scalar_lea.vmem %s4163_s25, 256  ;;  %p3391_p7 = scmp.lt.s32.totalorder %s4163_s25, %s4163_s25 }
  0x57   : > { %p3384_p0 = scmp.ne.s32.totalorder %s4163_s25, %s3383_s22  ;;  %p3392_p9 = scmp.lt.s32.totalorder %s3383_s22, %s3383_s22 }
  0x59   : > { %p3386_p2 = pnand %p3384_p0, %p4175_p8  ;;  %p3393_p4 = por %p3392_p9, %p3391_p7 }
  0x5b   : > { %p3387_p5 = pneg %p3386_p2 }
  0x5d   : > { %p3394_p10 = pnand %p3393_p4, %p3387_p5 }
  0x5f   : > { %3397 = shalt.err (!%p3394_p10)
}
  0x60   : > { %3152 = dma.hbm_to_vmem [thread:$0]  (!%p4159_p6), %s5055_s18, 256, %s4163_s25, [#allocation9], %s3989_s23, %s3989_s23, %s3990_s19  }
  0x61   : > { %s5056_s5 = sld [smem:[#allocation56_spill]] }
  0x67   : > { %s3398_s21 = scalar_lea.hbm %s5056_s5, 768 }
  0x68   : > { %p3399_p11 = scmp.ne.s32.totalorder %s5056_s5, %s3398_s21  ;;  %p3405_p0 = scmp.lt.u32.totalorder %s3398_s21, %s5056_s5 }
  0x6a   : > { %p3401_p12 = pnand %p3399_p11, %p4175_p8 }
  0x6c   : > { %p3402_p13 = pneg %p3401_p12 }
  0x6e   : > { %p3407_p2 = pnand %p3405_p0, %p3402_p13 }
  0x70   : > { %3410 = shalt.err (!%p3407_p2)
}
  0x71   : > { %s3411_s25 = scalar_lea.vmem %s4165_s27, 768  ;;  %p3419_p4 = scmp.lt.s32.totalorder %s4165_s27, %s4165_s27 }
  0x72   : > { %p3412_p5 = scmp.ne.s32.totalorder %s4165_s27, %s3411_s25  ;;  %p3420_p10 = scmp.lt.s32.totalorder %s3411_s25, %s3411_s25 }
  0x74   : > { %p3414_p7 = pnand %p3412_p5, %p4175_p8  ;;  %p3421_p11 = por %p3420_p10, %p3419_p4 }
  0x76   : > { %p3415_p9 = pneg %p3414_p7 }
  0x78   : > { %p3422_p12 = pnand %p3421_p11, %p3415_p9 }
  0x7a   : > { %3425 = shalt.err (!%p3422_p12)
}
  0x7b   : > { %3158 = dma.hbm_to_vmem [thread:$0]  (!%p4159_p6), %s5056_s5, 768, %s4165_s27, [#allocation12], %s3989_s23, %s3989_s23, %s3990_s19  }
  0x7c   : > { %s3991_s14 = smov [#allocation14]   ;;  %s3992_s30 = smov [#allocation17]  }
  0x7d   : > { %s563_s16 = sshll.u32 %s3991_s14, 4  ;;  %s590_s20 = sshll.u32 %s3992_s30, 4  ;;  %s564_s16 = int_to_ptr.vmem [resolvable:$true] %s563_s16  ;;  %s591_s20 = int_to_ptr.vmem [resolvable:$true] %s590_s20 }
  0x7e   : > { %s5057_s7 = sld [smem:[#allocation58_spill]] }
  0x84   : > { %s3426_s28 = scalar_lea.hbm %s5057_s7, 768 }
  0x85   : > { %p3427_p13 = scmp.ne.s32.totalorder %s5057_s7, %s3426_s28  ;;  %p3433_p5 = scmp.lt.u32.totalorder %s3426_s28, %s5057_s7 }
  0x87   : > { %p3429_p0 = pnand %p3427_p13, %p4175_p8 }
  0x89   : > { %p3430_p2 = pneg %p3429_p0 }
  0x8b   : > { %p3435_p7 = pnand %p3433_p5, %p3430_p2 }
  0x8d   : > { %3438 = shalt.err (!%p3435_p7)
}
  0x8e   : > { %s3439_s27 = scalar_lea.vmem %s564_s16, 768  ;;  %p3447_p11 = scmp.lt.s32.totalorder %s564_s16, %s564_s16 }
  0x8f   : > { %p3440_p9 = scmp.ne.s32.totalorder %s564_s16, %s3439_s27  ;;  %p3448_p12 = scmp.lt.s32.totalorder %s3439_s27, %s3439_s27 }
  0x91   : > { %p3442_p4 = pnand %p3440_p9, %p4175_p8  ;;  %p3449_p1 = por %p3448_p12, %p3447_p11 }
  0x93   : > { %p3443_p10 = pneg %p3442_p4 }
  0x95   : > { %p3450_p3 = pnand %p3449_p1, %p3443_p10 }
  0x97   : > { %3453 = shalt.err (!%p3450_p3)
}
  0x98   : > { %3164 = dma.hbm_to_vmem [thread:$0]  (!%p4159_p6), %s5057_s7, 768, %s564_s16, [#allocation15], %s3989_s23, %s3989_s23, %s3990_s19  }
  0x99   : > { %s5058_s9 = sld [smem:[#allocation60_spill]] }
  0x9f   : > { %s3454_s2 = scalar_lea.hbm %s5058_s9, 32 }
  0xa0   : > { %p3455_p1 = scmp.ne.s32.totalorder %s5058_s9, %s3454_s2  ;;  %p3461_p0 = scmp.lt.u32.totalorder %s3454_s2, %s5058_s9 }
  0xa2   : > { %p3457_p3 = pnand %p3455_p1, %p4175_p8 }
  0xa4   : > { %p3458_p13 = pneg %p3457_p3 }
  0xa6   : > { %p3463_p2 = pnand %p3461_p0, %p3458_p13 }
  0xa8   : > { %3466 = shalt.err (!%p3463_p2)
}
  0xa9   : > { %s3467_s0 = scalar_lea.vmem %s591_s20, 32  ;;  %p3475_p4 = scmp.lt.s32.totalorder %s591_s20, %s591_s20 }
  0xaa   : > { %p3468_p5 = scmp.ne.s32.totalorder %s591_s20, %s3467_s0  ;;  %p3476_p10 = scmp.lt.s32.totalorder %s3467_s0, %s3467_s0 }
  0xac   : > { %p3470_p7 = pnand %p3468_p5, %p4175_p8  ;;  %p3477_p11 = por %p3476_p10, %p3475_p4 }
  0xae   : > { %p3471_p9 = pneg %p3470_p7 }
  0xb0   : > { %p3478_p12 = pnand %p3477_p11, %p3471_p9 }
  0xb2   : > { %3481 = shalt.err (!%p3478_p12)
}
  0xb3   : > { %3170 = dma.hbm_to_vmem [thread:$0]  (!%p4159_p6), %s5058_s9, 32, %s591_s20, [#allocation18]  }
  0xb4   : > { %s3993_s22 = smov [#allocation20]   ;;  %s3994_s30 = smov [#allocation23]  }
  0xb5   : > { %s611_s14 = sshll.u32 %s3993_s22, 4  ;;  %s637_s21 = sshll.u32 %s3994_s30, 4  ;;  %s612_s14 = int_to_ptr.vmem [resolvable:$true] %s611_s14  ;;  %s638_s21 = int_to_ptr.vmem [resolvable:$true] %s637_s21 }
  0xb6   : > { %s5059_s11 = sld [smem:[#allocation62_spill]] }
  0xbc   : > { %s3482_s29 = scalar_lea.hbm %s5059_s11, 256 }
  0xbd   : > { %p3483_p1 = scmp.ne.s32.totalorder %s5059_s11, %s3482_s29  ;;  %p3489_p0 = scmp.lt.u32.totalorder %s3482_s29, %s5059_s11 }
  0xbf   : > { %p3485_p3 = pnand %p3483_p1, %p4175_p8 }
  0xc1   : > { %p3486_p13 = pneg %p3485_p3 }
  0xc3   : > { %p3491_p2 = pnand %p3489_p0, %p3486_p13 }
  0xc5   : > { %3494 = shalt.err (!%p3491_p2)
}
  0xc6   : > { %s3495_s20 = scalar_lea.vmem %s612_s14, 256  ;;  %p3503_p4 = scmp.lt.s32.totalorder %s612_s14, %s612_s14 }
  0xc7   : > { %p3496_p5 = scmp.ne.s32.totalorder %s612_s14, %s3495_s20  ;;  %p3504_p10 = scmp.lt.s32.totalorder %s3495_s20, %s3495_s20 }
  0xc9   : > { %p3498_p7 = pnand %p3496_p5, %p4175_p8  ;;  %p3505_p11 = por %p3504_p10, %p3503_p4 }
  0xcb   : > { %p3499_p9 = pneg %p3498_p7 }
  0xcd   : > { %p3506_p12 = pnand %p3505_p11, %p3499_p9 }
  0xcf   : > { %3509 = shalt.err (!%p3506_p12)
}
  0xd0   : > { %3176 = dma.hbm_to_vmem [thread:$0]  (!%p4159_p6), %s5059_s11, 256, %s612_s14, [#allocation21], %s3989_s23, %s3989_s23, %s3990_s19  }
  0xd1   : > { %s5060_s13 = sld [smem:[#allocation64_spill]] }
  0xd7   : > { %s3510_s28 = scalar_lea.hbm %s5060_s13, 512 }
  0xd8   : > { %p3511_p1 = scmp.ne.s32.totalorder %s5060_s13, %s3510_s28  ;;  %p3517_p0 = scmp.lt.u32.totalorder %s3510_s28, %s5060_s13 }
  0xda   : > { %p3513_p3 = pnand %p3511_p1, %p4175_p8 }
  0xdc   : > { %p3514_p13 = pneg %p3513_p3 }
  0xde   : > { %p3519_p2 = pnand %p3517_p0, %p3514_p13 }
  0xe0   : > { %3522 = shalt.err (!%p3519_p2)
}
  0xe1   : > { %s3523_s16 = scalar_lea.vmem %s638_s21, 512  ;;  %p3531_p4 = scmp.lt.s32.totalorder %s638_s21, %s638_s21 }
  0xe2   : > { %p3524_p5 = scmp.ne.s32.totalorder %s638_s21, %s3523_s16  ;;  %p3532_p10 = scmp.lt.s32.totalorder %s3523_s16, %s3523_s16 }
  0xe4   : > { %p3526_p7 = pnand %p3524_p5, %p4175_p8  ;;  %p3533_p11 = por %p3532_p10, %p3531_p4 }
  0xe6   : > { %p3527_p9 = pneg %p3526_p7 }
  0xe8   : > { %p3534_p12 = pnand %p3533_p11, %p3527_p9 }
  0xea   : > { %3537 = shalt.err (!%p3534_p12)
}
  0xeb   : > { %3182 = dma.hbm_to_vmem [thread:$0]  (!%p4159_p6), %s5060_s13, 512, %s638_s21, [#allocation24], %s3989_s23, %s3989_s23, %s3990_s19  }
  0xec   : > { %s3995_s27 = smov [#allocation26]   ;;  %s3996_s30 = smov [#allocation29]  }
  0xed   : > { %s663_s22 = sshll.u32 %s3995_s27, 4  ;;  %s690_s2 = sshll.u32 %s3996_s30, 4  ;;  %s664_s22 = int_to_ptr.vmem [resolvable:$true] %s663_s22  ;;  %s691_s2 = int_to_ptr.vmem [resolvable:$true] %s690_s2 }
  0xee   : > { %s3538_s26 = scalar_lea.hbm %s4996_s15, 512 }
  0xef   : > { %p3539_p1 = scmp.ne.s32.totalorder %s4996_s15, %s3538_s26  ;;  %p3545_p0 = scmp.lt.u32.totalorder %s3538_s26, %s4996_s15 }
  0xf1   : > { %p3541_p3 = pnand %p3539_p1, %p4175_p8 }
  0xf3   : > { %p3542_p13 = pneg %p3541_p3 }
  0xf5   : > { %p3547_p2 = pnand %p3545_p0, %p3542_p13 }
  0xf7   : > { %3550 = shalt.err (!%p3547_p2)
}
  0xf8   : > { %s3551_s21 = scalar_lea.vmem %s664_s22, 512  ;;  %p3559_p4 = scmp.lt.s32.totalorder %s664_s22, %s664_s22 }
  0xf9   : > { %p3552_p5 = scmp.ne.s32.totalorder %s664_s22, %s3551_s21  ;;  %p3560_p10 = scmp.lt.s32.totalorder %s3551_s21, %s3551_s21 }
  0xfb   : > { %p3554_p7 = pnand %p3552_p5, %p4175_p8  ;;  %p3561_p11 = por %p3560_p10, %p3559_p4 }
  0xfd   : > { %p3555_p9 = pneg %p3554_p7 }
  0xff   : > { %p3562_p12 = pnand %p3561_p11, %p3555_p9 }
 0x101   : > { %3565 = shalt.err (!%p3562_p12)
}
 0x102   : > { %3188 = dma.hbm_to_vmem [thread:$0]  (!%p4159_p6), %s4996_s15, 512, %s664_s22, [#allocation27], %s3989_s23, %s3989_s23, %s3990_s19  }
 0x103   : > { %s3566_s29 = scalar_lea.hbm %s4998_s17, 32 }
 0x104   : > { %p3567_p1 = scmp.ne.s32.totalorder %s4998_s17, %s3566_s29  ;;  %p3573_p0 = scmp.lt.u32.totalorder %s3566_s29, %s4998_s17 }
 0x106   : > { %p3569_p3 = pnand %p3567_p1, %p4175_p8 }
 0x108   : > { %p3570_p13 = pneg %p3569_p3 }
 0x10a   : > { %p3575_p2 = pnand %p3573_p0, %p3570_p13 }
 0x10c   : > { %3578 = shalt.err (!%p3575_p2)
}
 0x10d   : > { %s3579_s14 = scalar_lea.vmem %s691_s2, 32  ;;  %p3587_p4 = scmp.lt.s32.totalorder %s691_s2, %s691_s2 }
 0x10e   : > { %p3580_p5 = scmp.ne.s32.totalorder %s691_s2, %s3579_s14  ;;  %p3588_p10 = scmp.lt.s32.totalorder %s3579_s14, %s3579_s14 }
 0x110   : > { %p3582_p7 = pnand %p3580_p5, %p4175_p8  ;;  %p3589_p11 = por %p3588_p10, %p3587_p4 }
 0x112   : > { %p3583_p9 = pneg %p3582_p7 }
 0x114   : > { %p3590_p12 = pnand %p3589_p11, %p3583_p9 }
 0x116   : > { %3593 = shalt.err (!%p3590_p12)
}
 0x117   : > { %3194 = dma.hbm_to_vmem [thread:$0]  (!%p4159_p6), %s4998_s17, 32, %s691_s2, [#allocation30]  }
 0x118   : > { %s3997_s22 = smov [#allocation10]   ;;  %s5061_s4 = sld [smem:[#allocation55_spill]] }
 0x119   : > { %s524_s21 = sshll.u32 %s3997_s22, 4  ;;  %s525_s21 = int_to_ptr.vmem [resolvable:$true] %s524_s21 }
 0x11e   : > { %s3594_s30 = scalar_lea.hbm %s5061_s4, 512 }
 0x11f   : > { %p3595_p1 = scmp.ne.s32.totalorder %s5061_s4, %s3594_s30  ;;  %p3601_p0 = scmp.lt.u32.totalorder %s3594_s30, %s5061_s4 }
 0x121   : > { %p3597_p3 = pnand %p3595_p1, %p4175_p8 }
 0x123   : > { %p3598_p13 = pneg %p3597_p3 }
 0x125   : > { %p3603_p2 = pnand %p3601_p0, %p3598_p13 }
 0x127   : > { %3606 = shalt.err (!%p3603_p2)
}
 0x128   : > { %s3607_s2 = scalar_lea.vmem %s525_s21, 512  ;;  %p3615_p4 = scmp.lt.s32.totalorder %s525_s21, %s525_s21 }
 0x129   : > { %p3608_p5 = scmp.ne.s32.totalorder %s525_s21, %s3607_s2  ;;  %p3616_p10 = scmp.lt.s32.totalorder %s3607_s2, %s3607_s2 }
 0x12b   : > { %p3610_p7 = pnand %p3608_p5, %p4175_p8  ;;  %p3617_p11 = por %p3616_p10, %p3615_p4 }
 0x12d   : > { %p3611_p9 = pneg %p3610_p7 }
 0x12f   : > { %p3618_p12 = pnand %p3617_p11, %p3611_p9 }
 0x131   : > { %3621 = shalt.err (!%p3618_p12)
}
 0x132   : > { %s5022_s0 = smov 128   ;;  %s5020_s16 = smov 8  }
 0x133   : > { %3155 = dma.hbm_to_vmem [thread:$0]  (!%p4159_p6), %s5061_s4, 512, %s525_s21, [#allocation9], %s5022_s0, %s5022_s0, %s5020_s16  }
 0x134   : > { %s4000_s19 = smov [#allocation13]   ;;  %s4001_s20 = smov [#allocation16]  }
 0x135   : > { %s550_s22 = sshll.u32 %s4000_s19, 4  ;;  %s576_s27 = sshll.u32 %s4001_s20, 4  ;;  %s551_s22 = int_to_ptr.vmem [resolvable:$true] %s550_s22  ;;  %s4392_s27 = int_to_ptr.vmem [resolvable:$true] %s576_s27 }
 0x136   : > { %s5062_s6 = sld [smem:[#allocation57_spill]] }
 0x13c   : > { %s3622_s29 = scalar_lea.hbm %s5062_s6, 1536 }
 0x13d   : > { %p3623_p1 = scmp.ne.s32.totalorder %s5062_s6, %s3622_s29  ;;  %p3629_p0 = scmp.lt.u32.totalorder %s3622_s29, %s5062_s6 }
 0x13f   : > { %p3625_p3 = pnand %p3623_p1, %p4175_p8 }
 0x141   : > { %p3626_p13 = pneg %p3625_p3 }
 0x143   : > { %p3631_p2 = pnand %p3629_p0, %p3626_p13 }
 0x145   : > { %3634 = shalt.err (!%p3631_p2)
}
 0x146   : > { %s3635_s14 = scalar_lea.vmem %s551_s22, 1536  ;;  %p3643_p4 = scmp.lt.s32.totalorder %s551_s22, %s551_s22 }
 0x147   : > { %p3636_p5 = scmp.ne.s32.totalorder %s551_s22, %s3635_s14  ;;  %p3644_p10 = scmp.lt.s32.totalorder %s3635_s14, %s3635_s14 }
 0x149   : > { %p3638_p7 = pnand %p3636_p5, %p4175_p8  ;;  %p3645_p11 = por %p3644_p10, %p3643_p4 }
 0x14b   : > { %p3639_p9 = pneg %p3638_p7 }
 0x14d   : > { %p3646_p12 = pnand %p3645_p11, %p3639_p9 }
 0x14f   : > { %3649 = shalt.err (!%p3646_p12)
}
 0x150   : > { %3161 = dma.hbm_to_vmem [thread:$0]  (!%p4159_p6), %s5062_s6, 1536, %s551_s22, [#allocation12], %s5022_s0, %s5022_s0, %s5020_s16  }
 0x151   : > { %s5063_s8 = sld [smem:[#allocation59_spill]] }
 0x157   : > { %s3650_s28 = scalar_lea.hbm %s5063_s8, 1536 }
 0x158   : > { %p3651_p1 = scmp.ne.s32.totalorder %s5063_s8, %s3650_s28  ;;  %p3657_p0 = scmp.lt.u32.totalorder %s3650_s28, %s5063_s8 }
 0x15a   : > { %p3653_p3 = pnand %p3651_p1, %p4175_p8 }
 0x15c   : > { %p3654_p13 = pneg %p3653_p3 }
 0x15e   : > { %p3659_p2 = pnand %p3657_p0, %p3654_p13 }
 0x160   : > { %3662 = shalt.err (!%p3659_p2)
}
 0x161   : > { %s3663_s22 = scalar_lea.vmem %s4392_s27, 1536  ;;  %p3671_p4 = scmp.lt.s32.totalorder %s4392_s27, %s4392_s27 }
 0x162   : > { %p3664_p5 = scmp.ne.s32.totalorder %s4392_s27, %s3663_s22  ;;  %p3672_p10 = scmp.lt.s32.totalorder %s3663_s22, %s3663_s22 }
 0x164   : > { %p3666_p7 = pnand %p3664_p5, %p4175_p8  ;;  %p3673_p11 = por %p3672_p10, %p3671_p4 }
 0x166   : > { %p3667_p9 = pneg %p3666_p7 }
 0x168   : > { %p3674_p12 = pnand %p3673_p11, %p3667_p9 }
 0x16a   : > { %3677 = shalt.err (!%p3674_p12)
}
 0x16b   : > { %3167 = dma.hbm_to_vmem [thread:$0]  (!%p4159_p6), %s5063_s8, 1536, %s4392_s27, [#allocation15], %s5022_s0, %s5022_s0, %s5020_s16  }
 0x16c   : > { %s4002_s23 = smov [#allocation19]   ;;  %s4003_s20 = smov [#allocation22]  }
 0x16d   : > { %s601_s19 = sshll.u32 %s4002_s23, 4  ;;  %s624_s30 = sshll.u32 %s4003_s20, 4  ;;  %s602_s19 = int_to_ptr.vmem [resolvable:$true] %s601_s19  ;;  %s4441_s30 = int_to_ptr.vmem [resolvable:$true] %s624_s30 }
 0x16e   : > { %s5064_s10 = sld [smem:[#allocation61_spill]] }
 0x174   : > { %s3678_s26 = scalar_lea.hbm %s5064_s10, 64 }
 0x175   : > { %p3679_p1 = scmp.ne.s32.totalorder %s5064_s10, %s3678_s26  ;;  %p3685_p0 = scmp.lt.u32.totalorder %s3678_s26, %s5064_s10 }
 0x177   : > { %p3681_p3 = pnand %p3679_p1, %p4175_p8 }
 0x179   : > { %p3682_p13 = pneg %p3681_p3 }
 0x17b   : > { %p3687_p2 = pnand %p3685_p0, %p3682_p13 }
 0x17d   : > { %3690 = shalt.err (!%p3687_p2)
}
 0x17e   : > { %s3691_s21 = scalar_lea.vmem %s602_s19, 64  ;;  %p3699_p4 = scmp.lt.s32.totalorder %s602_s19, %s602_s19 }
 0x17f   : > { %p3692_p5 = scmp.ne.s32.totalorder %s602_s19, %s3691_s21  ;;  %p3700_p10 = scmp.lt.s32.totalorder %s3691_s21, %s3691_s21 }
 0x181   : > { %p3694_p7 = pnand %p3692_p5, %p4175_p8  ;;  %p3701_p11 = por %p3700_p10, %p3699_p4 }
 0x183   : > { %p3695_p9 = pneg %p3694_p7 }
 0x185   : > { %p3702_p12 = pnand %p3701_p11, %p3695_p9 }
 0x187   : > { %3705 = shalt.err (!%p3702_p12)
}
 0x188   : > { %3173 = dma.hbm_to_vmem [thread:$0]  (!%p4159_p6), %s5064_s10, 64, %s602_s19, [#allocation18]  }
 0x189   : > { %s5065_s12 = sld [smem:[#allocation63_spill]] }
 0x18f   : > { %s3706_s29 = scalar_lea.hbm %s5065_s12, 512 }
 0x190   : > { %p3707_p1 = scmp.ne.s32.totalorder %s5065_s12, %s3706_s29  ;;  %p3713_p0 = scmp.lt.u32.totalorder %s3706_s29, %s5065_s12 }
 0x192   : > { %p3709_p3 = pnand %p3707_p1, %p4175_p8 }
 0x194   : > { %p3710_p13 = pneg %p3709_p3 }
 0x196   : > { %p3715_p2 = pnand %p3713_p0, %p3710_p13 }
 0x198   : > { %3718 = shalt.err (!%p3715_p2)
}
 0x199   : > { %s3719_s19 = scalar_lea.vmem %s4441_s30, 512  ;;  %p3727_p4 = scmp.lt.s32.totalorder %s4441_s30, %s4441_s30 }
 0x19a   : > { %p3720_p5 = scmp.ne.s32.totalorder %s4441_s30, %s3719_s19  ;;  %p3728_p10 = scmp.lt.s32.totalorder %s3719_s19, %s3719_s19 }
 0x19c   : > { %p3722_p7 = pnand %p3720_p5, %p4175_p8  ;;  %p3729_p11 = por %p3728_p10, %p3727_p4 }
 0x19e   : > { %p3723_p9 = pneg %p3722_p7 }
 0x1a0   : > { %p3730_p12 = pnand %p3729_p11, %p3723_p9 }
 0x1a2   : > { %3733 = shalt.err (!%p3730_p12)
}
 0x1a3   : > { %3179 = dma.hbm_to_vmem [thread:$0]  (!%p4159_p6), %s5065_s12, 512, %s4441_s30, [#allocation21], %s5022_s0, %s5022_s0, %s5020_s16  }
 0x1a4   : > { %s4004_s14 = smov [#allocation25]   ;;  %s4005_s20 = smov [#allocation28]  }
 0x1a5   : > { %s650_s23 = sshll.u32 %s4004_s14, 4  ;;  %s676_s28 = sshll.u32 %s4005_s20, 4  ;;  %s651_s23 = int_to_ptr.vmem [resolvable:$true] %s650_s23  ;;  %s4487_s28 = int_to_ptr.vmem [resolvable:$true] %s676_s28 }
 0x1a6   : > { %s5066_s25 = sld [smem:[#allocation65_spill]] }
 0x1ac   : > { %s3734_s2 = scalar_lea.hbm %s5066_s25, 1024 }
 0x1ad   : > { %p3735_p1 = scmp.ne.s32.totalorder %s5066_s25, %s3734_s2  ;;  %p3741_p0 = scmp.lt.u32.totalorder %s3734_s2, %s5066_s25 }
 0x1af   : > { %p3737_p3 = pnand %p3735_p1, %p4175_p8 }
 0x1b1   : > { %p3738_p13 = pneg %p3737_p3 }
 0x1b3   : > { %p3743_p2 = pnand %p3741_p0, %p3738_p13 }
 0x1b5   : > { %3746 = shalt.err (!%p3743_p2)
}
 0x1b6   : > { %s3747_s21 = scalar_lea.vmem %s651_s23, 1024  ;;  %p3755_p4 = scmp.lt.s32.totalorder %s651_s23, %s651_s23 }
 0x1b7   : > { %p3748_p5 = scmp.ne.s32.totalorder %s651_s23, %s3747_s21  ;;  %p3756_p10 = scmp.lt.s32.totalorder %s3747_s21, %s3747_s21 }
 0x1b9   : > { %p3750_p7 = pnand %p3748_p5, %p4175_p8  ;;  %p3757_p11 = por %p3756_p10, %p3755_p4 }
 0x1bb   : > { %p3751_p9 = pneg %p3750_p7 }
 0x1bd   : > { %p3758_p12 = pnand %p3757_p11, %p3751_p9 }
 0x1bf   : > { %3761 = shalt.err (!%p3758_p12)
}
 0x1c0   : > { %3185 = dma.hbm_to_vmem [thread:$0]  (!%p4159_p6), %s5066_s25, 1024, %s651_s23, [#allocation24], %s5022_s0, %s5022_s0, %s5020_s16  }
 0x1c1   : > { %s5067_s2 = sld [smem:[#allocation66_spill]] }
 0x1c7   : > { %s3762_s22 = scalar_lea.hbm %s5067_s2, 1024 }
 0x1c8   : > { %p3763_p1 = scmp.ne.s32.totalorder %s5067_s2, %s3762_s22  ;;  %p3769_p0 = scmp.lt.u32.totalorder %s3762_s22, %s5067_s2 }
 0x1ca   : > { %p3765_p3 = pnand %p3763_p1, %p4175_p8 }
 0x1cc   : > { %p3766_p13 = pneg %p3765_p3 }
 0x1ce   : > { %p3771_p2 = pnand %p3769_p0, %p3766_p13 }
 0x1d0   : > { %3774 = shalt.err (!%p3771_p2)
}
 0x1d1   : > { %s3775_s23 = scalar_lea.vmem %s4487_s28, 1024  ;;  %p3783_p4 = scmp.lt.s32.totalorder %s4487_s28, %s4487_s28 }
 0x1d2   : > { %p3776_p5 = scmp.ne.s32.totalorder %s4487_s28, %s3775_s23  ;;  %p3784_p10 = scmp.lt.s32.totalorder %s3775_s23, %s3775_s23 }
 0x1d4   : > { %p3778_p7 = pnand %p3776_p5, %p4175_p8  ;;  %p3785_p11 = por %p3784_p10, %p3783_p4 }
 0x1d6   : > { %p3779_p9 = pneg %p3778_p7 }
 0x1d8   : > { %p3786_p12 = pnand %p3785_p11, %p3779_p9 }
 0x1da   : > { %3789 = shalt.err (!%p3786_p12)
}
 0x1db   : > { %3191 = dma.hbm_to_vmem [thread:$0]  (!%p4159_p6), %s5067_s2, 1024, %s4487_s28, [#allocation27], %s5022_s0, %s5022_s0, %s5020_s16  }
 0x1dc   : > { %s4006_s29 = smov [#allocation31]   ;;  %s5068_s27 = sld [smem:[#allocation67_spill]] }
 0x1dd   : > { %s701_s26 = sshll.u32 %s4006_s29, 4  ;;  %s702_s26 = int_to_ptr.vmem [resolvable:$true] %s701_s26 }
 0x1e2   : > { %s3790_s30 = scalar_lea.hbm %s5068_s27, 64 }
 0x1e3   : > { %p3791_p1 = scmp.ne.s32.totalorder %s5068_s27, %s3790_s30  ;;  %p3797_p0 = scmp.lt.u32.totalorder %s3790_s30, %s5068_s27 }
 0x1e5   : > { %p3793_p3 = pnand %p3791_p1, %p4175_p8 }
 0x1e7   : > { %p3794_p13 = pneg %p3793_p3 }
 0x1e9   : > { %p3799_p2 = pnand %p3797_p0, %p3794_p13 }
 0x1eb   : > { %3802 = shalt.err (!%p3799_p2)
}
 0x1ec   : > { %s3803_s28 = scalar_lea.vmem %s702_s26, 64  ;;  %p3811_p4 = scmp.lt.s32.totalorder %s702_s26, %s702_s26 }
 0x1ed   : > { %p3804_p5 = scmp.ne.s32.totalorder %s702_s26, %s3803_s28  ;;  %p3812_p10 = scmp.lt.s32.totalorder %s3803_s28, %s3803_s28 }
 0x1ef   : > { %p3806_p7 = pnand %p3804_p5, %p4175_p8  ;;  %p3813_p11 = por %p3812_p10, %p3811_p4 }
 0x1f1   : > { %p3807_p9 = pneg %p3806_p7 }
 0x1f3   : > { %p3814_p12 = pnand %p3813_p11, %p3807_p9 }
 0x1f5   : > { %3817 = shalt.err (!%p3814_p12)
}
 0x1f6   : > { %s5069_s4 = sld [smem:[#allocation48_spill]]  ;;  %s5070_s1 = sld [smem:[#allocation47_spill]] }
 0x1f7   : > { %s5071_s29 = sld [smem:[#allocation46_spill]]  ;;  %s5072_s24 = sld [smem:[#allocation45_spill]] }
 0x1f8   : > { %s5073_s22 = sld [smem:[#allocation49_spill]]  ;;  %s5081_s7 = sld [smem:[#allocation52_spill]] }
 0x1f9   : > { %3197 = dma.hbm_to_vmem [thread:$0]  (!%p4159_p6), %s5068_s27, 64, %s702_s26, [#allocation30]  }
 0x1fc   : > { %s2699_s19 = sadd.s32 4294967294, %s5069_s4   ;;  %s4556_s21 = sadd.s32 1, %s5069_s4  }
 0x1fd   : > { %s53_s3 = sadd.s32 1, %s5070_s1  ;;  %s50_s30 = ssub.s32 %s5069_s4, %s4556_s21 }
 0x1fe   : > { %p60_p8 = scmp.ne.s32.totalorder %s5070_s1, %s5071_s29  ;;  %p51_p1 = scmp.eq.s32.totalorder %s50_s30, 0 }
 0x1ff   : > { %p61_p3 = scmp.eq.s32.totalorder %s5069_s4, 0  ;;  %p66_p13 = scmp.ne.s32.totalorder %s5071_s29, %s5072_s24 }
 0x200   : > { %p473_p0 = scmp.eq.s32.totalorder %s5073_s22, 1  ;;  %p5074_p5 = scmp.eq.s32.totalorder %s5073_s22, 0 }
 0x201   : > { %s4568_s23 = scalar_select %p51_p1, %s5070_s1, %s53_s3  }
 0x202   : > { %p62_p2 = por %p61_p3, %p60_p8  ;;  %p4572_p7 = por %p5074_p5, %p66_p13 }
 0x203   : > { %p4576_p6 = por %p473_p0, %p60_p8  ;;  %p479_p9 = scmp.eq.s32.totalorder %s2699_s19, 1 }
 0x204   : > { %p3226_p4 = scmp.lt.s32.totalorder %s5069_s4, 2  ;;  %s712_s14 = sand.u32 1, %s5070_s1  }
 0x205   : > { %s5076_s26 = scalar_select %p4576_p6, 1, 0 }
 0x206   : > { %p4582_p10 = por %p479_p9, %p66_p13  ;;  %s4586_s29 = sshll.u32 %s712_s14, 4 }
 0x207   : > { %s2825_s24 = sshll.u32 %s5069_s4, 8  ;;  %s5078_s30 = sld [smem:[#allocation51_spill]] }
 0x208   : > { %s5077_s20 = scalar_select %p4582_p10, 1, 0 }
 0x209   : > { %s716_s19 = scalar_lea.vmem [#allocation2], %s4586_s29  ;;  %p4595_p11 = pnand %p3226_p4, %p62_p2 }
 0x20a   : > { %s723_s2 = sshll.u32 %s716_s19, 4  ;;  %s4604_s22 = scalar_lea.hbm %s5081_s7, %s2825_s24  ;;  %s4599_s2 = int_to_ptr.vmem [resolvable:$true] %s723_s2 }
 0x20b   : > { %s4606_s3 = scalar_lea.sflag [#allocation3], %s712_s14  ;;  %p3820_p8 = pneg %p4595_p11 }
 0x20d   : > { %s5079_s16 = smov %s5078_s30  ;;  %s4592_s0 = scalar_lea.hbm %s5078_s30, %s2825_s24 }
 0x20e   : > { %s3818_s30 = scalar_lea.hbm %s4592_s0, 256  ;;  %s3823_s9 = scalar_lea.hbm %s5079_s16, 512 }
 0x20f   : > { %p3819_p12 = scmp.ne.s32.totalorder %s4592_s0, %s3818_s30  ;;  %p3824_p13 = scmp.lt.u32.totalorder %s4592_s0, %s5079_s16 }
 0x210   : > { %p3825_p0 = scmp.lt.u32.totalorder %s3823_s9, %s3818_s30  ;;  %p3827_p5 = scmp.lt.u32.totalorder %s3818_s30, %s4592_s0 }
 0x211   : > { %p3821_p1 = pnand %p3820_p8, %p3819_p12 }
 0x212   : > { %p3826_p2 = por %p3825_p0, %p3824_p13 }
 0x213   : > { %p3822_p3 = pneg %p3821_p1 }
 0x214   : > { %p3828_p9 = por %p3827_p5, %p3826_p2 }
 0x216   : > { %p3829_p4 = pnand %p3828_p9, %p3822_p3 }
 0x218   : > { %3832 = shalt.err (!%p3829_p4)
}
 0x219   : > { %s3833_s5 = scalar_lea.vmem %s4599_s2, 256  ;;  %s4007_s6 = smov [#allocation2]  }
 0x21a   : > { %p3834_p12 = scmp.ne.s32.totalorder %s4599_s2, %s3833_s5  ;;  %s3838_s8 = sshll.u32 %s4007_s6, 4  ;;  %s3839_s8 = int_to_ptr.vmem [resolvable:$false] %s3838_s8 }
 0x21b   : > { %s3840_s10 = scalar_lea.vmem %s3839_s8, 512  ;;  %p3841_p6 = scmp.lt.s32.totalorder %s4599_s2, %s3839_s8 }
 0x21c   : > { %p3836_p1 = pnand %p3834_p12, %p3820_p8  ;;  %p3842_p13 = scmp.lt.s32.totalorder %s3840_s10, %s3833_s5 }
 0x21e   : > { %p3837_p10 = pneg %p3836_p1  ;;  %p3843_p0 = por %p3842_p13, %p3841_p6 }
 0x220   : > { %p3844_p2 = pnand %p3843_p0, %p3837_p10 }
 0x222   : > { %3847 = shalt.err (!%p3844_p2)
}
 0x223   : > { %s5082_s9 = smov 8   ;;  %s5083_s11 = smov 128  }
 0x224   : > { %3201 = dma.hbm_to_vmem [thread:$0]  (!%p4595_p11), %s4592_s0, 256, %s4599_s2, %s4606_s3, %s5083_s11, %s5083_s11, %s5082_s9  }
 0x225   : > { %s737_s14 = scalar_lea.vmem [#allocation5], %s4586_s29  ;;  %s733_s30 = sand.u32 1, %s5069_s4  }
 0x226   : > { %s744_s24 = sshll.u32 %s737_s14, 4  ;;  %s4641_s19 = scalar_lea.sflag [#allocation6], %s733_s30  ;;  %s4639_s24 = int_to_ptr.vmem [resolvable:$true] %s744_s24 }
 0x227   : > { %s3848_s5 = scalar_lea.hbm %s4604_s22, 256  ;;  %s3853_s10 = scalar_lea.hbm %s5081_s7, 512 }
 0x228   : > { %p3849_p6 = scmp.ne.s32.totalorder %s4604_s22, %s3848_s5  ;;  %p3854_p5 = scmp.lt.u32.totalorder %s4604_s22, %s5081_s7 }
 0x229   : > { %p3855_p9 = scmp.lt.u32.totalorder %s3853_s10, %s3848_s5  ;;  %p3857_p12 = scmp.lt.u32.totalorder %s3848_s5, %s4604_s22 }
 0x22a   : > { %p3851_p10 = pnand %p3849_p6, %p3820_p8 }
 0x22b   : > { %p3856_p4 = por %p3855_p9, %p3854_p5 }
 0x22c   : > { %p3852_p3 = pneg %p3851_p10 }
 0x22d   : > { %p3858_p1 = por %p3857_p12, %p3856_p4 }
 0x22f   : > { %p3859_p13 = pnand %p3858_p1, %p3852_p3 }
 0x231   : > { %3862 = shalt.err (!%p3859_p13)
}
 0x232   : > { %s3863_s0 = scalar_lea.vmem %s4639_s24, 256  ;;  %s4008_s2 = smov [#allocation5]  }
 0x233   : > { %p3864_p0 = scmp.ne.s32.totalorder %s4639_s24, %s3863_s0  ;;  %s3868_s4 = sshll.u32 %s4008_s2, 4  ;;  %s3869_s4 = int_to_ptr.vmem [resolvable:$false] %s3868_s4 }
 0x234   : > { %s3870_s12 = scalar_lea.vmem %s3869_s4, 512  ;;  %p3871_p10 = scmp.lt.s32.totalorder %s4639_s24, %s3869_s4 }
 0x235   : > { %p3866_p2 = pnand %p3864_p0, %p3820_p8  ;;  %p3872_p5 = scmp.lt.s32.totalorder %s3870_s12, %s3863_s0 }
 0x237   : > { %p3867_p6 = pneg %p3866_p2  ;;  %p3873_p9 = por %p3872_p5, %p3871_p10 }
 0x239   : > { %p3874_p4 = pnand %p3873_p9, %p3867_p6 }
 0x23b   : > { %3877 = shalt.err (!%p3874_p4)
}
 0x23c   : > { %3204 = dma.hbm_to_vmem [thread:$0]  (!%p4595_p11), %s4604_s22, 256, %s4639_s24, %s4641_s19, %s5083_s11, %s5083_s11, %s5082_s9  }
 0x23d   : > { %s5084_s13 = sld [smem:[#allocation50_spill]] }
 0x243   : > { %p5085_p8 = scmp.ne.s32.totalorder %s5084_s13, 0 }
 0x244   : > { %s5086_s29 = sld [smem:[#allocation46_spill]] (!%p5085_p8) }
 0x245   : > { %756 = sbr.rel (%p5085_p8) target bundleno = 4552 (0x11c8), region = 96 }
 0x24a   : > { %s4673_s3 = sand.u32 (!%p5085_p8), 1, %s5086_s29  }
 0x24b   : > { %s2726_s14 = sshll.u32 (!%p5085_p8), %s4673_s3, 4  ;;  %s759_s30 = scalar_lea.sflag (!%p5085_p8), [#allocation3], %s4673_s3 }
 0x24c   : > { %s4677_s5 = scalar_lea.vmem [#allocation2], %s2726_s14 }
 0x24d   : > { %3923 = dma.done.wait (%p4572_p7), %s759_s30, 256  }
 0x24e   : > { %3925 = vsyncadd (%p4572_p7), %s759_s30, 4294967040  ;;  %s5087_s1 = sld [smem:[#allocation49_spill]]  ;;  %s771_s11 = scalar_lea.vmem [#allocation5], %s2726_s14 }
 0x254   : > { %s767_s22 = sand.u32 1, %s5087_s1  }
 0x255   : > { %s768_s9 = scalar_lea.sflag [#allocation6], %s767_s22 }
 0x256   : > { %3927 = dma.done.wait (%p4572_p7), %s768_s9, 256  }
 0x257   : > { %3929 = vsyncadd (%p4572_p7), %s768_s9, 4294967040  ;;  %p5088_p11 = scmp.eq.s32.totalorder %s5087_s1, 0 }
 0x259   : > { %3931 = dma.done.wait (%p5088_p11), [#allocation6], 256   ;;  %p5089_p3 = pmov %p5088_p11 }
 0x25b   : > { %3933 = vsyncadd (%p5089_p3), [#allocation6], 4294967040  ;;  %p5090_p12 = pmov %p5089_p3 }
 0x25c   : > { %p5091_p1 = pmov %p5089_p3 }
 0x25d   : > { %3935 = dma.done.wait (%p5090_p12), [#allocation9], 768  }
 0x25e   : > { %3937 = vsyncadd (%p5091_p1), [#allocation9], 4294966528  ;;  %p5092_p13 = pmov %p5091_p1 }
 0x25f   : > { %p5093_p0 = pmov %p5091_p1 }
 0x260   : > { %3939 = dma.done.wait (%p5092_p13), [#allocation12], 2304  }
 0x261   : > { %3941 = vsyncadd (%p5093_p0), [#allocation12], 4294964992  ;;  %p5094_p7 = pmov %p5093_p0 }
 0x262   : > { %p5095_p2 = pmov %p5093_p0 }
 0x263   : > { %3943 = dma.done.wait (%p5094_p7), [#allocation15], 2304  }
 0x264   : > { %3945 = vsyncadd (%p5095_p2), [#allocation15], 4294964992  ;;  %p5096_p6 = pmov %p5093_p0 }
 0x265   : > { %p5097_p10 = pmov %p5093_p0 }
 0x266   : > { %3947 = dma.done.wait (%p5096_p6), [#allocation18], 96  }
 0x267   : > { %3949 = vsyncadd (%p5097_p10), [#allocation18], 4294967200  ;;  %p5098_p5 = pmov %p5093_p0 }
 0x268   : > { %p5099_p9 = pmov %p5093_p0 }
 0x269   : > { %3951 = dma.done.wait (%p5098_p5), [#allocation21], 768  }
 0x26a   : > { %3953 = vsyncadd (%p5099_p9), [#allocation21], 4294966528  ;;  %p5100_p4 = pmov %p5093_p0 }
 0x26b   : > { %p5101_p8 = pmov %p5093_p0 }
 0x26c   : > { %3955 = dma.done.wait (%p5100_p4), [#allocation24], 1536  }
 0x26d   : > { %3957 = vsyncadd (%p5101_p8), [#allocation24], 4294965760  ;;  %p5102_p11 = pmov %p5093_p0 }
 0x26e   : > { %p5103_p3 = pmov %p5093_p0 }
 0x26f   : > { %3959 = dma.done.wait (%p5102_p11), [#allocation27], 1536  }
 0x270   : > { %3961 = vsyncadd (%p5103_p3), [#allocation27], 4294965760  ;;  %p5104_p12 = pmov %p5093_p0 }
 0x271   : > { %p5105_p1 = pmov %p5093_p0 }
 0x272   : > { %3963 = dma.done.wait (%p5104_p12), [#allocation30], 96  }
 0x273   : > { %3965 = vsyncadd (%p5105_p1), [#allocation30], 4294967200  ;;  %v4009_v0 = vmov 0   ;;  %v911_v1 = vld [vmem:[%s771_s11] sm:$0xff]  ;;  %v912_v2 = vld [vmem:[%s771_s11 + $0x8] sm:$0xff]  ;;  %vm928_vm0 = vcmask 64512  }
 0x274   : > { %3310 = vset.pattern.permute.xlu0 %v4009_v0  ;;  %3311 = vset.pattern.permute.xlu1 %v4009_v0  ;;  %v913_v3 = vpack.c.bf16 %v912_v2, %v911_v1  ;;  %v3312_v4 = vld [vmem:[#allocation8] sm:$0xff]   ;;  %v905_v7 = vld [vmem:[%s4677_s5 + $0x8] sm:$0xff]  ;;  %v900_v10 = vld [vmem:[#allocation10] sm:$0xff]  ;;  %s4010_s28 = smov 1   ;;  %s4011_s24 = smov 127   ;;  %vm1144_vm1 = vcmask 785408  }
 0x275   : > { %v904_v5 = vld [vmem:[%s4677_s5] sm:$0xff]  ;;  %2904 = vmatprep.mubr.msk.bf16.mxu0 %vm928_vm0, %v3312_v4  ;;  %v3313_v9 = vld [vmem:[#allocation8 + $0x8] sm:$0xff]   ;;  %1057 = vperm.xlu0 %3310, %v900_v10   ;;  %v901_v14 = vld [vmem:[#allocation10 + $0x8] sm:$0xff]  ;;  %vm1087_vm2 = vcmask 7168   ;;  %vm1099_vm4 = vcmask 121856   ;;  %vm1244_vm5 = vcmask 261120  }
 0x276   : > { %3060 = vmatprep.subr.msk.bf16.mxu0 %vm928_vm0, %v913_v3  ;;  %v936_v6 = vsel %vm928_vm0, %v913_v3, 0  ;;  %v906_v8 = vpack.c.bf16 %v905_v7, %v904_v5  ;;  %v902_v11 = vld [vmem:[#allocation10 + $0x10] sm:$0xff]  ;;  %v3314_v13 = vld [vmem:[#allocation7] sm:$0xff]   ;;  %v903_v15 = vld [vmem:[#allocation10 + $0x18] sm:$0xff]  ;;  %s4012_s19 = smov 2   ;;  %s4013_s6 = smov 126  }
 0x277   : > { %2903 = vmatpush3.bf16.xpose.msra.mxu0 %v936_v6  ;;  %1067 = vperm.xlu1 %3311, %v902_v11   ;;  %v3315_v16 = vld [vmem:[#allocation7 + $0x8] sm:$0xff]   ;;  %v1111_v31 = vld [vmem:[#allocation13 + $0x8] sm:$0xff]  ;;  %v1110_v32 = vld [vmem:[#allocation13] sm:$0xff]  ;;  %vm1312_vm6 = vcmask 15360   ;;  %vm1323_vm8 = vcmask 113664   ;;  %s4014_s8 = smov 4  }
 0x278   : > { %3061 = vmatprep.subr.msk.bf16.mxu0 %vm928_vm0, %v906_v8  ;;  %v1004_v12 = vsel %vm928_vm0, %v906_v8, 0  ;;  %v1113_v33 = vld [vmem:[#allocation13 + $0x18] sm:$0xff]  ;;  %v3316_v34 = vld [vmem:[#allocation11] sm:$0xff]   ;;  %v1211_v38 = vld [vmem:[#allocation16 + $0x18] sm:$0xff]  ;;  %s4015_s10 = smov 124   ;;  %vm1538_vm9 = vcmask 31744  }
 0x279   : > { %1062 = vperm.xlu0 %3310, %v901_v14   ;;  %v1112_v35 = vld [vmem:[#allocation13 + $0x10] sm:$0xff]  ;;  %2926 = vmatprep.mubr.msk.bf16.mxu1 %vm1144_vm1, %v3316_v34  ;;  %v1209_v36 = vld [vmem:[#allocation16 + $0x8] sm:$0xff]  ;;  %v1210_v39 = vld [vmem:[#allocation16 + $0x10] sm:$0xff]  ;;  %vm1549_vm11 = vcmask 97280   ;;  %vm4017_vm12 = vmmov 0   ;;  %vm1868_vm13 = vcmask 23552  }
 0x27a   : > { %v1208_v37 = vld [vmem:[#allocation16] sm:$0xff]  ;;  %vm4751_vm3 = vmneg %vm1087_vm2  ;;  %v3317_v47 = vld [vmem:[#allocation11 + $0x8] sm:$0xff]   ;;  %s2745_s0 = sshll.u32 %s4673_s3, 3  ;;  %vm1808_vm14 = vcmask 124928   ;;  %vm1875_vm15 = vcmask 1040384   ;;  %s2822_s12 = sshll.u32 %s5087_s1, 6 }
 0x27b   : > { %1072 = vperm.xlu1 %3311, %v903_v15   ;;  %v3318_v48 = vld [vmem:[#allocation14] sm:$0xff]   ;;  %v3319_v3 = vld [vmem:[#allocation14 + $0x8] sm:$0xff]   ;;  %vm4791_vm7 = vmneg %vm1312_vm6  ;;  %s4843_s2 = scalar_lea.vmem [#allocation32], %s2745_s0  ;;  %s5110_s14 = sld [smem:[#allocation68_spill]] }
 0x27c   : > { %vm2780_vm10 = vmneg %vm1538_vm9  ;;  %v3332_v40 = vld [vmem:[#allocation26] sm:$0xff]   ;;  %s2442_s4 = sshll.u32 %s4843_s2, 4  ;;  %s2430_s5 = scalar_lea.sflag [#allocation4], %s4673_s3  ;;  %s4929_s4 = int_to_ptr.vmem [resolvable:$true] %s2442_s4 }
 0x27d   : > { %s3878_s1 = scalar_lea.vmem %s4929_s4, 128  ;;  %p5111_p0 = scmp.ne.s32.totalorder %s5076_s26, 0 }
 0x27e   : > { %2905 = vmatmul.mubr.msk.bf16.vlgmr.msra.gmra.mrb[0].mxu0 %vm928_vm0, %v3313_v9  ;;  %p3879_p13 = scmp.ne.s32.totalorder %s4929_s4, %s3878_s1  ;;  %s4019_s22 = smov [#allocation32]  }
 0x27f   : > { %2909 = vmatpush3.bf16.xpose.msra.mxu0 %v1004_v12  ;;  %2910 = vmatprep.mubr.msk.bf16.mxu0 %vm928_vm0, %v3314_v13  ;;  %s3882_s9 = sshll.u32 %s4019_s22, 4  ;;  %s3883_s9 = int_to_ptr.vmem [resolvable:$false] %s3882_s9 }
 0x280   : > { %p3880_p7 = pnand %p3879_p13, %p5111_p0  ;;  %s3884_s11 = scalar_lea.vmem %s3883_s9, 256 }
 0x281   : > { %s4934_s30 = scalar_lea.hbm %s5110_s14, %s2822_s12  ;;  %p3885_p6 = scmp.lt.s32.totalorder %s4929_s4, %s3883_s9 }
 0x282   : > { %p3881_p2 = pneg %p3880_p7  ;;  %p3886_p10 = scmp.lt.s32.totalorder %s3884_s11, %s3878_s1 }
 0x284   : > { %p3887_p5 = por %p3886_p10, %p3885_p6 }
 0x286   : > { %p3888_p9 = pnand %p3887_p5, %p3881_p2 }
 0x28a   : > { %2911 = vmatmul.mubr.msk.bf16.vlgmr.msra.gmra.mrb[0].mxu0 %vm928_vm0, %v3315_v16  ;;  %vm1876_vm0 = vcmask 1041408  }
 0x28b   : > { %2934 = vmatprep.mubr.msk.bf16.mxu0 %vm1244_vm5, %v3318_v48 }
 0x2f4   : > { %v1058_v18 = vpop.permute.xlu0 %1057 }
 0x2f6   : > { %v1068_v17 = vpop.permute.xlu1 %1067 }
 0x2f8   : > { %v1063_v23 = vpop.permute.xlu0 %1062 }
 0x2fa   : > { %v1073_v20 = vpop.permute.xlu1 %1072 }
 0x35d   : > { %v2912_v19 = vpop.f32.mrb[0].mxu0 }
 0x35e   : > { %v1040_v21 = vpop.f32.mrb[1].mxu0  ;;  %v4734_v24 = vadd.f32 %v2912_v19, %v1068_v17 }
 0x35f   : > { %v2913_v22 = vpop.f32.mrb[2].mxu0  ;;  %v4738_v27 = vadd.f32 %v1058_v18, %v1040_v21 }
 0x360   : > { %v4736_v25 = vadd.f32 %v2913_v22, %v1073_v20  ;;  %v1043_v26 = vpop.f32.mrb[3].mxu0  ;;  %v1337_v22 = vld [vmem:[#allocation13 + $0x28] sm:$0xff] }
 0x361   : > { %v4740_v28 = vadd.f32 %v1063_v23, %v1043_v26  ;;  %v1336_v23 = vld [vmem:[#allocation13 + $0x20] sm:$0xff]  ;;  %v1338_v26 = vld [vmem:[#allocation13 + $0x30] sm:$0xff] }
 0x362   : > { %v1080_v29 = vpack.c.bf16 %v4736_v25, %v4734_v24 }
 0x363   : > { %v1079_v30 = vpack.c.bf16 %v4740_v28, %v4738_v27 }
 0x364   : > { %1085 = vrot.lane.b32.xlu1 %v1080_v29, %s4010_s28 }
 0x365   : > { %1083 = vrot.lane.b32.xlu0 %v1079_v30, %s4010_s28 }
 0x368   : > { %1097 = vrot.lane.b32.xlu1 %v1080_v29, %s4011_s24 }
 0x369   : > { %1095 = vrot.lane.b32.xlu0 %v1079_v30, %s4011_s24 }
 0x36c   : > { %1121 = vperm.xlu1 %3311, %v1111_v31   ;;  %v3336_v31 = vld [vmem:[#allocation26 + $0x10] sm:$0xff]  }
 0x36d   : > { %1116 = vperm.xlu0 %3310, %v1110_v32  }
 0x370   : > { %1131 = vperm.xlu1 %3311, %v1113_v33  }
 0x371   : > { %1126 = vperm.xlu0 %3310, %v1112_v35  }
 0x374   : > { %1221 = vperm.xlu1 %3311, %v1209_v36  }
 0x375   : > { %1216 = vperm.xlu0 %3310, %v1208_v37  }
 0x378   : > { %1231 = vperm.xlu1 %3311, %v1211_v38   ;;  %v3321_v38 = vld [vmem:[#allocation11 + $0x18] sm:$0xff]  }
 0x379   : > { %1226 = vperm.xlu0 %3310, %v1210_v39   ;;  %v3322_v39 = vld [vmem:[#allocation14 + $0x10] sm:$0xff]  }
 0x3d6   : > { %v1086_v42 = vpop.permute.xlu1 %1085 }
 0x3d7   : > { %v1084_v41 = vpop.permute.xlu0 %1083 }
 0x3d8   : > { %2914 = vmatprep.subr.msk.bf16.mxu1 %vm4751_vm3, %v1084_v41 }
 0x3d9   : > { %2915 = vmatpush3.bf16.msk.msra.mxu1 %vm4751_vm3, %v1084_v41 }
 0x3da   : > { %2916 = vmatprep.subr.msk.bf16.mxu1 %vm4751_vm3, %v1086_v42  ;;  %v1098_v45 = vpop.permute.xlu1 %1097 }
 0x3db   : > { %v1096_v43 = vpop.permute.xlu0 %1095  ;;  %v1104_v46 = vsel %vm1099_vm4, %v1098_v45, 0 }
 0x3dc   : > { %v1101_v44 = vsel %vm1099_vm4, %v1096_v43, 0 }
 0x3dd   : > { %2917 = vmatpush3.bf16.msk.msra.mxu1 %vm4751_vm3, %v1086_v42 }
 0x3de   : > { %2918 = vmatprep.subr.bf16.mxu1 %v1079_v30 }
 0x3e1   : > { %2919 = vmatpush3.bf16.msra.mxu1 %v1079_v30  ;;  %v1437_v30 = vld [vmem:[#allocation16 + $0x30] sm:$0xff] }
 0x3e2   : > { %2920 = vmatprep.subr.bf16.mxu1 %v1080_v29 }
 0x3e5   : > { %2921 = vmatpush3.bf16.msra.mxu1 %v1080_v29  ;;  %v1438_v29 = vld [vmem:[#allocation16 + $0x38] sm:$0xff] }
 0x3e6   : > { %3062 = vmatprep.subr.msk.bf16.mxu1 %vm1099_vm4, %v1096_v43 }
 0x3e9   : > { %2923 = vmatpush3.bf16.msra.mxu1 %v1101_v44 }
 0x3ea   : > { %3063 = vmatprep.subr.msk.bf16.mxu1 %vm1099_vm4, %v1098_v45 }
 0x3eb   : > { %v1122_v50 = vpop.permute.xlu1 %1121 }
 0x3ec   : > { %v1117_v49 = vpop.permute.xlu0 %1116 }
 0x3ed   : > { %2925 = vmatpush3.bf16.msra.mxu1 %v1104_v46 }
 0x3ef   : > { %v1132_v55 = vpop.permute.xlu1 %1131 }
 0x3f0   : > { %2927 = vmatmul.mubr.msk.bf16.vlgmr.msra.gmra.mrb[0].mxu1 %vm1144_vm1, %v3317_v47  ;;  %v1127_v51 = vpop.permute.xlu0 %1126 }
 0x3f1   : > { %2958 = vmatprep.mubr.msk.bf16.mxu1 %vm1244_vm5, %v3322_v39 }
 0x3f3   : > { %v1222_v5 = vpop.permute.xlu1 %1221 }
 0x3f4   : > { %v1217_v4 = vpop.permute.xlu0 %1216 }
 0x3f7   : > { %v1232_v10 = vpop.permute.xlu1 %1231 }
 0x3f8   : > { %v1227_v6 = vpop.permute.xlu0 %1226 }
 0x4c3   : > { %v2928_v52 = vpop.f32.mrb[0].mxu1 }
 0x4c4   : > { %v1194_v53 = vadd.f32 %v2928_v52, %v1127_v51  ;;  %v1185_v54 = vpop.f32.mrb[1].mxu1 }
 0x4c5   : > { %v1186_v56 = vadd.f32 %v1185_v54, %v1117_v49  ;;  %v2929_v57 = vpop.f32.mrb[2].mxu1 }
 0x4c6   : > { %v1197_v58 = vadd.f32 %v2929_v57, %v1132_v55  ;;  %v1188_v59 = vpop.f32.mrb[3].mxu1  ;;  %v1202_v61 = vmax.f32 %v1194_v53, 0.0 }
 0x4c7   : > { %v1189_v60 = vadd.f32 %v1188_v59, %v1122_v50  ;;  %v1200_v63 = vmax.f32 %v1186_v56, 0.0  ;;  %v3323_v59 = vld [vmem:[#allocation14 + $0x18] sm:$0xff]  }
 0x4c8   : > { %v1203_v62 = vmax.f32 %v1197_v58, 0.0 }
 0x4c9   : > { %v1201_v0 = vmax.f32 %v1189_v60, 0.0 }
 0x4ca   : > { %v1213_v1 = vpack.c.bf16 %v1203_v62, %v1202_v61 }
 0x4cb   : > { %v1212_v2 = vpack.c.bf16 %v1201_v0, %v1200_v63 }
 0x4cd   : > { %2930 = vmatprep.subr.bf16.mxu0 %v1212_v2 }
 0x4ce   : > { %2931 = vmatpush3.bf16.msra.mxu0 %v1212_v2 }
 0x4cf   : > { %2932 = vmatprep.subr.bf16.mxu0 %v1213_v1 }
 0x4d2   : > { %2933 = vmatpush3.bf16.msra.mxu0 %v1213_v1 }
 0x4d5   : > { %2935 = vmatmul.mubr.msk.bf16.vlgmr.msra.gmra.mrb[4].mxu0 %vm1244_vm5, %v3319_v3 }
 0x5a8   : > { %v2936_v7 = vpop.f32.mrb[4].mxu0 }
 0x5a9   : > { %v1294_v8 = vadd.f32 %v2936_v7, %v1227_v6  ;;  %v1285_v9 = vpop.f32.mrb[5].mxu0 }
 0x5aa   : > { %v1286_v11 = vadd.f32 %v1285_v9, %v1217_v4  ;;  %v2937_v12 = vpop.f32.mrb[6].mxu0 }
 0x5ab   : > { %v1297_v13 = vadd.f32 %v2937_v12, %v1232_v10  ;;  %v1288_v14 = vpop.f32.mrb[7].mxu0  ;;  %v4771_v16 = vadd.f32 %v1294_v8, %v4734_v24  ;;  %v1339_v24 = vld [vmem:[#allocation13 + $0x38] sm:$0xff] }
 0x5ac   : > { %v1289_v15 = vadd.f32 %v1288_v14, %v1222_v5  ;;  %v4777_v18 = vadd.f32 %v1286_v11, %v4738_v27  ;;  %v1436_v27 = vld [vmem:[#allocation16 + $0x28] sm:$0xff]  ;;  %v1563_v14 = vld [vmem:[#allocation13 + $0x48] sm:$0xff] }
 0x5ad   : > { %v4774_v17 = vadd.f32 %v1297_v13, %v4736_v25  ;;  %v3320_v25 = vld [vmem:[#allocation11 + $0x10] sm:$0xff]  }
 0x5ae   : > { %v4780_v19 = vadd.f32 %v1289_v15, %v4740_v28  ;;  %2950 = vmatprep.mubr.msk.bf16.mxu0 %vm1144_vm1, %v3320_v25  ;;  %v1435_v28 = vld [vmem:[#allocation16 + $0x20] sm:$0xff]  ;;  %v1562_v15 = vld [vmem:[#allocation13 + $0x40] sm:$0xff] }
 0x5af   : > { %v1305_v20 = vpack.c.bf16 %v4774_v17, %v4771_v16  ;;  %v1835_v25 = vld [vmem:[#allocation22 + $0x10] sm:$0xff] }
 0x5b0   : > { %v1304_v21 = vpack.c.bf16 %v4780_v19, %v4777_v18 }
 0x5b1   : > { %1310 = vrot.lane.b32.xlu1 %v1305_v20, %s4012_s19 }
 0x5b2   : > { %1308 = vrot.lane.b32.xlu0 %v1304_v21, %s4012_s19 }
 0x5b5   : > { %1321 = vrot.lane.b32.xlu1 %v1305_v20, %s4013_s6 }
 0x5b6   : > { %1319 = vrot.lane.b32.xlu0 %v1304_v21, %s4013_s6 }
 0x5b9   : > { %1347 = vperm.xlu1 %3311, %v1337_v22   ;;  %v1663_v22 = vld [vmem:[#allocation16 + $0x50] sm:$0xff] }
 0x5ba   : > { %1342 = vperm.xlu0 %3310, %v1336_v23   ;;  %v1833_v23 = vld [vmem:[#allocation22] sm:$0xff] }
 0x5bd   : > { %1357 = vperm.xlu1 %3311, %v1339_v24   ;;  %v1757_v24 = vld [vmem:[#allocation19] sm:$0x7] }
 0x5be   : > { %1352 = vperm.xlu0 %3310, %v1338_v26   ;;  %v1834_v26 = vld [vmem:[#allocation22 + $0x8] sm:$0xff] }
 0x5c1   : > { %1448 = vperm.xlu1 %3311, %v1436_v27   ;;  %v1836_v27 = vld [vmem:[#allocation22 + $0x18] sm:$0xff] }
 0x5c2   : > { %1443 = vperm.xlu0 %3310, %v1435_v28  }
 0x5c5   : > { %1458 = vperm.xlu1 %3311, %v1438_v29  }
 0x5c6   : > { %1453 = vperm.xlu0 %3310, %v1437_v30  }
 0x623   : > { %v1311_v33 = vpop.permute.xlu1 %1310 }
 0x624   : > { %v1309_v32 = vpop.permute.xlu0 %1308 }
 0x625   : > { %2938 = vmatprep.subr.msk.bf16.mxu0 %vm4791_vm7, %v1309_v32 }
 0x626   : > { %2939 = vmatpush3.bf16.msk.msra.mxu0 %vm4791_vm7, %v1309_v32 }
 0x627   : > { %2940 = vmatprep.subr.msk.bf16.mxu0 %vm4791_vm7, %v1311_v33  ;;  %v1322_v36 = vpop.permute.xlu1 %1321 }
 0x628   : > { %v1320_v34 = vpop.permute.xlu0 %1319  ;;  %v1328_v37 = vsel %vm1323_vm8, %v1322_v36, 0 }
 0x629   : > { %v1325_v35 = vsel %vm1323_vm8, %v1320_v34, 0 }
 0x62a   : > { %2941 = vmatpush3.bf16.msk.msra.mxu0 %vm4791_vm7, %v1311_v33 }
 0x62b   : > { %2942 = vmatprep.subr.bf16.mxu0 %v1304_v21 }
 0x62e   : > { %2943 = vmatpush3.bf16.msra.mxu0 %v1304_v21  ;;  %v1664_v21 = vld [vmem:[#allocation16 + $0x58] sm:$0xff] }
 0x62f   : > { %2944 = vmatprep.subr.bf16.mxu0 %v1305_v20 }
 0x632   : > { %2945 = vmatpush3.bf16.msra.mxu0 %v1305_v20  ;;  %v1661_v20 = vld [vmem:[#allocation16 + $0x40] sm:$0xff] }
 0x633   : > { %3064 = vmatprep.subr.msk.bf16.mxu0 %vm1323_vm8, %v1320_v34 }
 0x636   : > { %2947 = vmatpush3.bf16.msra.mxu0 %v1325_v35  ;;  %v3325_v35 = vld [vmem:[#allocation11 + $0x28] sm:$0xff]  }
 0x637   : > { %3065 = vmatprep.subr.msk.bf16.mxu0 %vm1323_vm8, %v1322_v36  ;;  %v3326_v36 = vld [vmem:[#allocation14 + $0x20] sm:$0xff]  }
 0x638   : > { %v1348_v42 = vpop.permute.xlu1 %1347 }
 0x639   : > { %v1343_v41 = vpop.permute.xlu0 %1342 }
 0x63a   : > { %2949 = vmatpush3.bf16.msra.mxu0 %v1328_v37 }
 0x63c   : > { %v1358_v47 = vpop.permute.xlu1 %1357 }
 0x63d   : > { %2951 = vmatmul.mubr.msk.bf16.vlgmr.msra.gmra.mrb[8].mxu0 %vm1144_vm1, %v3321_v38  ;;  %v1353_v43 = vpop.permute.xlu0 %1352 }
 0x63e   : > { %2982 = vmatprep.mubr.msk.bf16.mxu0 %vm1244_vm5, %v3326_v36 }
 0x640   : > { %v1449_v61 = vpop.permute.xlu1 %1448 }
 0x641   : > { %v1444_v60 = vpop.permute.xlu0 %1443 }
 0x644   : > { %v1459_v2 = vpop.permute.xlu1 %1458 }
 0x645   : > { %v1454_v62 = vpop.permute.xlu0 %1453 }
 0x710   : > { %v2952_v44 = vpop.f32.mrb[8].mxu0 }
 0x711   : > { %v1419_v45 = vadd.f32 %v2952_v44, %v1353_v43  ;;  %v1410_v46 = vpop.f32.mrb[9].mxu0 }
 0x712   : > { %v1411_v48 = vadd.f32 %v1410_v46, %v1343_v41  ;;  %v2953_v49 = vpop.f32.mrb[10].mxu0 }
 0x713   : > { %v1422_v50 = vadd.f32 %v2953_v49, %v1358_v47  ;;  %v1413_v51 = vpop.f32.mrb[11].mxu0  ;;  %v1427_v53 = vmax.f32 %v1419_v45, 0.0 }
 0x714   : > { %v1414_v52 = vadd.f32 %v1413_v51, %v1348_v42  ;;  %v1425_v55 = vmax.f32 %v1411_v48, 0.0 }
 0x715   : > { %v1428_v54 = vmax.f32 %v1422_v50, 0.0 }
 0x716   : > { %v1426_v56 = vmax.f32 %v1414_v52, 0.0 }
 0x717   : > { %v1440_v57 = vpack.c.bf16 %v1428_v54, %v1427_v53 }
 0x718   : > { %v1439_v58 = vpack.c.bf16 %v1426_v56, %v1425_v55  ;;  %v3327_v56 = vld [vmem:[#allocation14 + $0x28] sm:$0xff]  }
 0x71a   : > { %2954 = vmatprep.subr.bf16.mxu1 %v1439_v58 }
 0x71b   : > { %2955 = vmatpush3.bf16.msra.mxu1 %v1439_v58 }
 0x71c   : > { %2956 = vmatprep.subr.bf16.mxu1 %v1440_v57 }
 0x71f   : > { %2957 = vmatpush3.bf16.msra.mxu1 %v1440_v57  ;;  %v4016_v57 = vmov 0.0  }
 0x722   : > { %2959 = vmatmul.mubr.msk.bf16.vlgmr.msra.gmra.mrb[4].mxu1 %vm1244_vm5, %v3323_v59 }
 0x7f5   : > { %v2960_v63 = vpop.f32.mrb[4].mxu1 }
 0x7f6   : > { %v1520_v0 = vadd.f32 %v2960_v63, %v1454_v62  ;;  %v1511_v1 = vpop.f32.mrb[5].mxu1 }
 0x7f7   : > { %v1512_v3 = vadd.f32 %v1511_v1, %v1444_v60  ;;  %v2961_v4 = vpop.f32.mrb[6].mxu1 }
 0x7f8   : > { %v1523_v5 = vadd.f32 %v2961_v4, %v1459_v2  ;;  %v1514_v6 = vpop.f32.mrb[7].mxu1  ;;  %v4811_v8 = vadd.f32 %v1520_v0, %v4771_v16  ;;  %v1565_v16 = vld [vmem:[#allocation13 + $0x58] sm:$0xff] }
 0x7f9   : > { %v1515_v7 = vadd.f32 %v1514_v6, %v1449_v61  ;;  %v4817_v10 = vadd.f32 %v1512_v3, %v4777_v18  ;;  %v1564_v18 = vld [vmem:[#allocation13 + $0x50] sm:$0xff] }
 0x7fa   : > { %v4814_v9 = vadd.f32 %v1523_v5, %v4774_v17  ;;  %v3324_v17 = vld [vmem:[#allocation11 + $0x20] sm:$0xff]  }
 0x7fb   : > { %v4820_v11 = vadd.f32 %v1515_v7, %v4780_v19  ;;  %2974 = vmatprep.mubr.msk.bf16.mxu1 %vm1144_vm1, %v3324_v17  ;;  %v1662_v19 = vld [vmem:[#allocation16 + $0x48] sm:$0xff] }
 0x7fc   : > { %v1531_v12 = vpack.c.bf16 %v4814_v9, %v4811_v8  ;;  %v3328_v17 = vld [vmem:[#allocation20] sm:$0xff]  }
 0x7fd   : > { %v1530_v13 = vpack.c.bf16 %v4820_v11, %v4817_v10 }
 0x7fe   : > { %1536 = vrot.lane.b32.xlu1 %v1531_v12, %s4014_s8 }
 0x7ff   : > { %1534 = vrot.lane.b32.xlu0 %v1530_v13, %s4014_s8 }
 0x802   : > { %1547 = vrot.lane.b32.xlu1 %v1531_v12, %s4015_s10 }
 0x803   : > { %1545 = vrot.lane.b32.xlu0 %v1530_v13, %s4015_s10 }
 0x806   : > { %1573 = vperm.xlu1 %3311, %v1563_v14  }
 0x807   : > { %1568 = vperm.xlu0 %3310, %v1562_v15  }
 0x80a   : > { %1583 = vperm.xlu1 %3311, %v1565_v16   ;;  %v1756_v16 = vld [vmem:[#allocation17] sm:$0x3] }
 0x80b   : > { %1578 = vperm.xlu0 %3310, %v1564_v18  }
 0x80e   : > { %1674 = vperm.xlu1 %3311, %v1662_v19  }
 0x80f   : > { %1669 = vperm.xlu0 %3310, %v1661_v20  }
 0x812   : > { %1684 = vperm.xlu1 %3311, %v1664_v21  }
 0x813   : > { %1679 = vperm.xlu0 %3310, %v1663_v22  }
 0x816   : > { %1840 = vperm.xlu1 %3311, %v1833_v23  }
 0x817   : > { %1762 = vperm.xlu0 %3310, %v1757_v24  }
 0x81a   : > { %1850 = vperm.xlu1 %3311, %v1835_v25  }
 0x81b   : > { %1845 = vperm.xlu0 %3310, %v1834_v26  }
 0x81f   : > { %1855 = vperm.xlu0 %3310, %v1836_v27  }
 0x870   : > { %v1537_v29 = vpop.permute.xlu1 %1536 }
 0x871   : > { %v1535_v28 = vpop.permute.xlu0 %1534 }
 0x872   : > { %2962 = vmatprep.subr.msk.bf16.mxu1 %vm2780_vm10, %v1535_v28 }
 0x873   : > { %2963 = vmatpush3.bf16.msk.msra.mxu1 %vm2780_vm10, %v1535_v28 }
 0x874   : > { %2964 = vmatprep.subr.msk.bf16.mxu1 %vm2780_vm10, %v1537_v29  ;;  %v1548_v33 = vpop.permute.xlu1 %1547 }
 0x875   : > { %v1546_v30 = vpop.permute.xlu0 %1545  ;;  %v1554_v34 = vsel %vm1549_vm11, %v1548_v33, 0 }
 0x876   : > { %v1551_v32 = vsel %vm1549_vm11, %v1546_v30, 0 }
 0x877   : > { %2965 = vmatpush3.bf16.msk.msra.mxu1 %vm2780_vm10, %v1537_v29 }
 0x878   : > { %2966 = vmatprep.subr.bf16.mxu1 %v1530_v13 }
 0x87b   : > { %2967 = vmatpush3.bf16.msra.mxu1 %v1530_v13 }
 0x87c   : > { %2968 = vmatprep.subr.bf16.mxu1 %v1531_v12 }
 0x87f   : > { %2969 = vmatpush3.bf16.msra.mxu1 %v1531_v12 }
 0x880   : > { %3066 = vmatprep.subr.msk.bf16.mxu1 %vm1549_vm11, %v1546_v30 }
 0x883   : > { %2971 = vmatpush3.bf16.msra.mxu1 %v1551_v32 }
 0x884   : > { %3067 = vmatprep.subr.msk.bf16.mxu1 %vm1549_vm11, %v1548_v33 }
 0x885   : > { %v1574_v38 = vpop.permute.xlu1 %1573 }
 0x886   : > { %v1569_v37 = vpop.permute.xlu0 %1568 }
 0x887   : > { %2973 = vmatpush3.bf16.msra.mxu1 %v1554_v34 }
 0x889   : > { %v1584_v44 = vpop.permute.xlu1 %1583 }
 0x88a   : > { %2975 = vmatmul.mubr.msk.bf16.vlgmr.msra.gmra.mrb[8].mxu1 %vm1144_vm1, %v3325_v35  ;;  %v1579_v39 = vpop.permute.xlu0 %1578 }
 0x88b   : > { %2996 = vmatprep.mubr.msk.bf16.mxu1 %vm1868_vm13, %v3328_v17  ;;  %v3331_v17 = vld [vmem:[#allocation23 + $0x8] sm:$0xff]  }
 0x88d   : > { %v1675_v59 = vpop.permute.xlu1 %1674 }
 0x88e   : > { %v1670_v58 = vpop.permute.xlu0 %1669 }
 0x891   : > { %v1685_v0 = vpop.permute.xlu1 %1684 }
 0x892   : > { %v1680_v60 = vpop.permute.xlu0 %1679 }
 0x95d   : > { %v2976_v41 = vpop.f32.mrb[8].mxu1 }
 0x95e   : > { %v1645_v42 = vadd.f32 %v2976_v41, %v1579_v39  ;;  %v1636_v43 = vpop.f32.mrb[9].mxu1 }
 0x95f   : > { %v1637_v45 = vadd.f32 %v1636_v43, %v1569_v37  ;;  %v2977_v46 = vpop.f32.mrb[10].mxu1 }
 0x960   : > { %v1648_v47 = vadd.f32 %v2977_v46, %v1584_v44  ;;  %v1639_v48 = vpop.f32.mrb[11].mxu1  ;;  %v1653_v50 = vmax.f32 %v1645_v42, 0.0  ;;  %v3329_v46 = vld [vmem:[#allocation20 + $0x8] sm:$0xff]  }
 0x961   : > { %v1640_v49 = vadd.f32 %v1639_v48, %v1574_v38  ;;  %v1651_v52 = vmax.f32 %v1637_v45, 0.0  ;;  %v4018_v38 = vmov 65535  }
 0x962   : > { %v1654_v51 = vmax.f32 %v1648_v47, 0.0  ;;  %v1877_v39 = vsel %vm1875_vm15, 4294967295, %v4018_v38  ;;  %v1841_v47 = vpop.permute.xlu1 %1840 }
 0x963   : > { %v1652_v53 = vmax.f32 %v1640_v49, 0.0  ;;  %v1878_v43 = vsel %vm1876_vm0, %v1877_v39, 0 }
 0x964   : > { %v1666_v54 = vpack.c.bf16 %v1654_v51, %v1653_v50 }
 0x965   : > { %v1665_v55 = vpack.c.bf16 %v1652_v53, %v1651_v52 }
 0x966   : > { %v1851_v50 = vpop.permute.xlu1 %1850 }
 0x967   : > { %2978 = vmatprep.subr.bf16.mxu0 %v1665_v55 }
 0x968   : > { %2979 = vmatpush3.bf16.msra.mxu0 %v1665_v55 }
 0x969   : > { %2980 = vmatprep.subr.bf16.mxu0 %v1666_v54 }
 0x96c   : > { %2981 = vmatpush3.bf16.msra.mxu0 %v1666_v54 }
 0x96d   : > { %2986 = vmatprep.subr.bf16.mxu0 %v4016_v57 }
 0x96f   : > { %2983 = vmatmul.mubr.msk.bf16.vlgmr.msra.gmra.mrb[12].mxu0 %vm1244_vm5, %v3327_v56 }
 0x970   : > { %2990 = vmatprep.mubr.msk.bf16.mxu0 %vm4017_vm12, %v4016_v57 }
 0xa42   : > { %v2984_v61 = vpop.f32.mrb[12].mxu0 }
 0xa43   : > { %v1746_v62 = vadd.f32 %v2984_v61, %v1680_v60  ;;  %v1737_v63 = vpop.f32.mrb[13].mxu0 }
 0xa44   : > { %v1738_v1 = vadd.f32 %v1737_v63, %v1670_v58  ;;  %v2985_v2 = vpop.f32.mrb[14].mxu0  ;;  %v1959_v63 = vld [vmem:[#allocation25] sm:$0xff] }
 0xa45   : > { %v1749_v3 = vadd.f32 %v2985_v2, %v1685_v0  ;;  %v1740_v4 = vpop.f32.mrb[15].mxu0  ;;  %v1754_v6 = vadd.f32 %v1746_v62, %v4811_v8  ;;  %v1763_v8 = vpop.permute.xlu0 %1762  ;;  %v1960_v62 = vld [vmem:[#allocation25 + $0x8] sm:$0xff]  ;;  %v1962_v0 = vld [vmem:[#allocation25 + $0x18] sm:$0xff]  ;;  %v1961_v2 = vld [vmem:[#allocation25 + $0x10] sm:$0xff] }
 0xa46   : > { %v1741_v5 = vadd.f32 %v1740_v4, %v1675_v59  ;;  %v1752_v12 = vadd.f32 %v1738_v1, %v4817_v10  ;;  %v3330_v1 = vld [vmem:[#allocation23] sm:$0xff]  }
 0xa47   : > { %v1755_v7 = vadd.f32 %v1749_v3, %v4814_v9  ;;  %v2057_v3 = vld [vmem:[#allocation28 + $0x8] sm:$0xff]  ;;  %v2056_v4 = vld [vmem:[#allocation28] sm:$0xff] }
 0xa48   : > { %v1753_v13 = vadd.f32 %v1741_v5, %v4820_v11  ;;  %v2059_v5 = vld [vmem:[#allocation28 + $0x18] sm:$0xff] }
 0xa49   : > { %v1759_v14 = vpack.c.bf16 %v1755_v7, %v1754_v6  ;;  %v1846_v48 = vpop.permute.xlu0 %1845  ;;  %v2058_v6 = vld [vmem:[#allocation28 + $0x10] sm:$0xff] }
 0xa4a   : > { %v1758_v15 = vpack.c.bf16 %v1753_v13, %v1752_v12 }
 0xa4c   : > { %2987 = vmatpush3.bf16.msra.mxu0 %v1758_v15 }
 0xa4d   : > { %2988 = vmatprep.subr.bf16.mxu0 %v4016_v57  ;;  %v1856_v52 = vpop.permute.xlu0 %1855 }
 0xa50   : > { %2989 = vmatpush3.bf16.msra.mxu0 %v1759_v14 }
 0xa53   : > { %2991 = vmatmul.mubr.msk.bf16.vlgmr.msra.gmra.mrb[16].mxu0 %vm1244_vm5, %v1756_v16 }
 0xa54   : > { %3012 = vmatprep.mubr.msk.bf16.mxu0 %vm1144_vm1, %v3330_v1 }
 0xb26   : > { %v1802_v9 = vpop.f32.mrb[16].mxu0 }
 0xb27   : > { %v1803_v10 = vadd.f32 %v1802_v9, %v1763_v8  ;;  %v2992_v18 = vpop.f32.mrb[17].mxu0 }
 0xb28   : > { %v1805_v11 = vpop.f32.mrb[18].mxu0 }
 0xb29   : > { %1809 = vst.msk [vmem:[%s4843_s2] sm:$0x7] %vm1808_vm14, %v1803_v10  ;;  %v1810_v19 = vsel %vm1808_vm14, %v1803_v10, -inf  ;;  %v2993_v20 = vpop.f32.mrb[19].mxu0 }
 0xb2a   : > { %v1811_v21 = vrot.slane %v1810_v19, 4 }
 0xb2c   : > { %v1812_v22 = vmax.f32 %v1810_v19, %v1811_v21 }
 0xb2e   : > { %v1813_v23 = vrot.slane %v1812_v22, 2 }
 0xb30   : > { %v1814_v24 = vmax.f32 %v1812_v22, %v1813_v23 }
 0xb32   : > { %v1815_v25 = vrot.slane %v1814_v24, 1 }
 0xb34   : > { %v1816_v26 = vmax.f32 %v1814_v24, %v1815_v25 }
 0xb36   : > { %v1817_v27 = vsub.f32 %v1803_v10, %v1816_v26 }
 0xb38   : > { %v1818_v28 = vmul.f32 1.442695, %v1817_v27 }
 0xb3a   : > { %3338 = vpow2.f32 %v1818_v28 }
 0xb44   : > { %v3339_v29 = vpop.eup %3338 }
 0xb45   : > { %v1820_v30 = vsel %vm1808_vm14, %v3339_v29, 0.0 }
 0xb46   : > { %v1821_v32 = vrot.slane %v1820_v30, 4 }
 0xb48   : > { %v1822_v33 = vadd.f32 %v1821_v32, %v1820_v30 }
 0xb4a   : > { %v1823_v34 = vrot.slane %v1822_v33, 2 }
 0xb4c   : > { %v1824_v35 = vadd.f32 %v1823_v34, %v1822_v33  ;;  %v3333_v33 = vld [vmem:[#allocation26 + $0x8] sm:$0xff]  }
 0xb4e   : > { %v1825_v36 = vrot.slane %v1824_v35, 1 }
 0xb50   : > { %v1826_v37 = vadd.f32 %v1825_v36, %v1824_v35 }
 0xb52   : > { %3340 = vrcp.f32 %v1826_v37 }
 0xb5c   : > { %v3341_v41 = vpop.eup %3340 }
 0xb5d   : > { %v1828_v42 = vmul.f32 %v3341_v41, %v3339_v29 }
 0xb5f   : > { %v1837_v44 = vpack.c.bf16 %v1828_v42, %v1828_v42 }
 0xb61   : > { %v1880_v45 = vand.u32 %v1878_v43, %v1837_v44 }
 0xb63   : > { %2994 = vmatprep.subr.bf16.mxu1 %v1880_v45 }
 0xb64   : > { %2995 = vmatpush3.bf16.msra.mxu1 %v1880_v45 }
 0xb67   : > { %2997 = vmatmul.mubr.msk.bf16.vlgmr.msra.gmra.mrb[12].mxu1 %vm1868_vm13, %v3329_v46 }
 0xb68   : > { %3020 = vmatprep.mubr.msk.bf16.mxu1 %vm1244_vm5, %v3332_v40 }
 0xc3a   : > { %v2998_v49 = vpop.f32.mrb[12].mxu1 }
 0xc3b   : > { %v1916_v51 = vpop.f32.mrb[13].mxu1  ;;  %v4850_v54 = vadd.f32 %v2998_v49, %v1851_v50 }
 0xc3c   : > { %v2999_v53 = vpop.f32.mrb[14].mxu1  ;;  %v4854_v58 = vadd.f32 %v1916_v51, %v1841_v47 }
 0xc3d   : > { %v4852_v55 = vadd.f32 %v2999_v53, %v1856_v52  ;;  %v1919_v56 = vpop.f32.mrb[15].mxu1  ;;  %v2182_v53 = vld [vmem:[#allocation25 + $0x28] sm:$0xff] }
 0xc3e   : > { %v4856_v59 = vadd.f32 %v1919_v56, %v1846_v48  ;;  %v3334_v56 = vld [vmem:[#allocation23 + $0x10] sm:$0xff]  }
 0xc3f   : > { %v1932_v60 = vpack.c.bf16 %v4852_v55, %v4850_v54 }
 0xc40   : > { %v1931_v61 = vpack.c.bf16 %v4856_v59, %v4854_v58 }
 0xc41   : > { %1937 = vrot.lane.b32.xlu0 %v1932_v60, %s4010_s28 }
 0xc42   : > { %1935 = vrot.lane.b32.xlu1 %v1931_v61, %s4010_s28 }
 0xc45   : > { %1947 = vrot.lane.b32.xlu0 %v1932_v60, %s4011_s24 }
 0xc46   : > { %1945 = vrot.lane.b32.xlu1 %v1931_v61, %s4011_s24 }
 0xc49   : > { %1970 = vperm.xlu0 %3310, %v1960_v62   ;;  %v2282_v62 = vld [vmem:[#allocation28 + $0x30] sm:$0xff] }
 0xc4a   : > { %1965 = vperm.xlu1 %3311, %v1959_v63   ;;  %v2376_v63 = vld [vmem:[#allocation31] sm:$0x7] }
 0xc4d   : > { %1980 = vperm.xlu0 %3310, %v1962_v0  }
 0xc4e   : > { %1975 = vperm.xlu1 %3311, %v1961_v2  }
 0xc51   : > { %2069 = vperm.xlu0 %3310, %v2057_v3  }
 0xc52   : > { %2064 = vperm.xlu1 %3311, %v2056_v4  }
 0xc55   : > { %2079 = vperm.xlu0 %3310, %v2059_v5  }
 0xc56   : > { %2074 = vperm.xlu1 %3311, %v2058_v6   ;;  %v3335_v6 = vld [vmem:[#allocation23 + $0x18] sm:$0xff]  }
 0xcb3   : > { %v1938_v12 = vpop.permute.xlu0 %1937 }
 0xcb4   : > { %v1936_v7 = vpop.permute.xlu1 %1935 }
 0xcb5   : > { %3000 = vmatprep.subr.msk.bf16.mxu0 %vm4751_vm3, %v1936_v7 }
 0xcb6   : > { %3001 = vmatpush3.bf16.msk.msra.mxu0 %vm4751_vm3, %v1936_v7 }
 0xcb7   : > { %3002 = vmatprep.subr.msk.bf16.mxu0 %vm4751_vm3, %v1938_v12  ;;  %v1948_v15 = vpop.permute.xlu0 %1947 }
 0xcb8   : > { %v1946_v13 = vpop.permute.xlu1 %1945  ;;  %v1953_v16 = vsel %vm1099_vm4, %v1948_v15, 0 }
 0xcb9   : > { %v1950_v14 = vsel %vm1099_vm4, %v1946_v13, 0 }
 0xcba   : > { %3003 = vmatpush3.bf16.msk.msra.mxu0 %vm4751_vm3, %v1938_v12 }
 0xcbb   : > { %3004 = vmatprep.subr.bf16.mxu0 %v1931_v61 }
 0xcbe   : > { %3005 = vmatpush3.bf16.msra.mxu0 %v1931_v61  ;;  %v2283_v61 = vld [vmem:[#allocation28 + $0x38] sm:$0xff] }
 0xcbf   : > { %3006 = vmatprep.subr.bf16.mxu0 %v1932_v60 }
 0xcc2   : > { %3007 = vmatpush3.bf16.msra.mxu0 %v1932_v60  ;;  %v2280_v60 = vld [vmem:[#allocation28 + $0x20] sm:$0xff] }
 0xcc3   : > { %3068 = vmatprep.subr.msk.bf16.mxu0 %vm1099_vm4, %v1946_v13 }
 0xcc6   : > { %3009 = vmatpush3.bf16.msra.mxu0 %v1950_v14 }
 0xcc7   : > { %3069 = vmatprep.subr.msk.bf16.mxu0 %vm1099_vm4, %v1948_v15 }
 0xcc8   : > { %v1971_v9 = vpop.permute.xlu0 %1970 }
 0xcc9   : > { %v1966_v8 = vpop.permute.xlu1 %1965 }
 0xcca   : > { %3011 = vmatpush3.bf16.msra.mxu0 %v1953_v16 }
 0xccc   : > { %v1981_v20 = vpop.permute.xlu0 %1980 }
 0xccd   : > { %3013 = vmatmul.mubr.msk.bf16.vlgmr.msra.gmra.mrb[20].mxu0 %vm1144_vm1, %v3331_v17  ;;  %v1976_v10 = vpop.permute.xlu1 %1975 }
 0xcce   : > { %3044 = vmatprep.mubr.msk.bf16.mxu0 %vm1244_vm5, %v3336_v31 }
 0xcd0   : > { %v2070_v35 = vpop.permute.xlu0 %2069 }
 0xcd1   : > { %v2065_v34 = vpop.permute.xlu1 %2064 }
 0xcd4   : > { %v2080_v41 = vpop.permute.xlu0 %2079 }
 0xcd5   : > { %v2075_v36 = vpop.permute.xlu1 %2074 }
 0xda0   : > { %v3014_v18 = vpop.f32.mrb[20].mxu0 }
 0xda1   : > { %v2042_v11 = vadd.f32 %v3014_v18, %v1976_v10  ;;  %v2033_v19 = vpop.f32.mrb[21].mxu0 }
 0xda2   : > { %v2034_v21 = vadd.f32 %v2033_v19, %v1966_v8  ;;  %v3015_v22 = vpop.f32.mrb[22].mxu0 }
 0xda3   : > { %v2045_v23 = vadd.f32 %v3015_v22, %v1981_v20  ;;  %v2036_v24 = vpop.f32.mrb[23].mxu0  ;;  %v2050_v26 = vmax.f32 %v2042_v11, 0.0 }
 0xda4   : > { %v2037_v25 = vadd.f32 %v2036_v24, %v1971_v9  ;;  %v2048_v28 = vmax.f32 %v2034_v21, 0.0  ;;  %v3337_v24 = vld [vmem:[#allocation26 + $0x18] sm:$0xff]  }
 0xda5   : > { %v2051_v27 = vmax.f32 %v2045_v23, 0.0 }
 0xda6   : > { %v2049_v29 = vmax.f32 %v2037_v25, 0.0 }
 0xda7   : > { %v2061_v30 = vpack.c.bf16 %v2051_v27, %v2050_v26 }
 0xda8   : > { %v2060_v32 = vpack.c.bf16 %v2049_v29, %v2048_v28 }
 0xdaa   : > { %3016 = vmatprep.subr.bf16.mxu1 %v2060_v32 }
 0xdab   : > { %3017 = vmatpush3.bf16.msra.mxu1 %v2060_v32 }
 0xdac   : > { %3018 = vmatprep.subr.bf16.mxu1 %v2061_v30 }
 0xdaf   : > { %3019 = vmatpush3.bf16.msra.mxu1 %v2061_v30 }
 0xdb2   : > { %3021 = vmatmul.mubr.msk.bf16.vlgmr.msra.gmra.mrb[16].mxu1 %vm1244_vm5, %v3333_v33 }
 0xdb3   : > { %3036 = vmatprep.mubr.msk.bf16.mxu1 %vm1144_vm1, %v3334_v56 }
 0xe85   : > { %v3022_v37 = vpop.f32.mrb[16].mxu1 }
 0xe86   : > { %v2141_v38 = vadd.f32 %v3022_v37, %v2075_v36  ;;  %v2132_v39 = vpop.f32.mrb[17].mxu1 }
 0xe87   : > { %v2133_v42 = vadd.f32 %v2132_v39, %v2065_v34  ;;  %v3023_v43 = vpop.f32.mrb[18].mxu1 }
 0xe88   : > { %v2144_v44 = vadd.f32 %v3023_v43, %v2080_v41  ;;  %v2135_v45 = vpop.f32.mrb[19].mxu1  ;;  %v4883_v47 = vadd.f32 %v2141_v38, %v4850_v54  ;;  %v2181_v54 = vld [vmem:[#allocation25 + $0x20] sm:$0xff] }
 0xe89   : > { %v2136_v46 = vadd.f32 %v2135_v45, %v2070_v35  ;;  %v4889_v49 = vadd.f32 %v2133_v42, %v4854_v58  ;;  %v2183_v58 = vld [vmem:[#allocation25 + $0x30] sm:$0xff]  ;;  %v2375_v45 = vld [vmem:[#allocation29] sm:$0x3] }
 0xe8a   : > { %v4886_v48 = vadd.f32 %v2144_v44, %v4852_v55  ;;  %v2184_v55 = vld [vmem:[#allocation25 + $0x38] sm:$0xff] }
 0xe8b   : > { %v4892_v50 = vadd.f32 %v2136_v46, %v4856_v59  ;;  %v2281_v59 = vld [vmem:[#allocation28 + $0x28] sm:$0xff] }
 0xe8c   : > { %v2152_v51 = vpack.c.bf16 %v4886_v48, %v4883_v47 }
 0xe8d   : > { %v2151_v52 = vpack.c.bf16 %v4892_v50, %v4889_v49 }
 0xe8e   : > { %2157 = vrot.lane.b32.xlu0 %v2152_v51, %s4012_s19 }
 0xe8f   : > { %2155 = vrot.lane.b32.xlu1 %v2151_v52, %s4012_s19 }
 0xe92   : > { %2167 = vrot.lane.b32.xlu0 %v2152_v51, %s4013_s6 }
 0xe93   : > { %2165 = vrot.lane.b32.xlu1 %v2151_v52, %s4013_s6 }
 0xe96   : > { %2192 = vperm.xlu0 %3310, %v2182_v53  }
 0xe97   : > { %2187 = vperm.xlu1 %3311, %v2181_v54  }
 0xe9a   : > { %2202 = vperm.xlu0 %3310, %v2184_v55  }
 0xe9b   : > { %2197 = vperm.xlu1 %3311, %v2183_v58  }
 0xe9e   : > { %2293 = vperm.xlu0 %3310, %v2281_v59  }
 0xe9f   : > { %2288 = vperm.xlu1 %3311, %v2280_v60  }
 0xea2   : > { %2303 = vperm.xlu0 %3310, %v2283_v61  }
 0xea3   : > { %2298 = vperm.xlu1 %3311, %v2282_v62  }
 0xea7   : > { %2381 = vperm.xlu1 %3311, %v2376_v63  }
 0xf00   : > { %v2158_v1 = vpop.permute.xlu0 %2157 }
 0xf01   : > { %v2156_v0 = vpop.permute.xlu1 %2155 }
 0xf02   : > { %3024 = vmatprep.subr.msk.bf16.mxu1 %vm4791_vm7, %v2156_v0 }
 0xf03   : > { %3025 = vmatpush3.bf16.msk.msra.mxu1 %vm4791_vm7, %v2156_v0 }
 0xf04   : > { %3026 = vmatprep.subr.msk.bf16.mxu1 %vm4791_vm7, %v2158_v1  ;;  %v2168_v4 = vpop.permute.xlu0 %2167 }
 0xf05   : > { %v2166_v2 = vpop.permute.xlu1 %2165  ;;  %v2173_v5 = vsel %vm1323_vm8, %v2168_v4, 0 }
 0xf06   : > { %v2170_v3 = vsel %vm1323_vm8, %v2166_v2, 0 }
 0xf07   : > { %3027 = vmatpush3.bf16.msk.msra.mxu1 %vm4791_vm7, %v2158_v1 }
 0xf08   : > { %3028 = vmatprep.subr.bf16.mxu1 %v2151_v52 }
 0xf0b   : > { %3029 = vmatpush3.bf16.msra.mxu1 %v2151_v52 }
 0xf0c   : > { %3030 = vmatprep.subr.bf16.mxu1 %v2152_v51 }
 0xf0f   : > { %3031 = vmatpush3.bf16.msra.mxu1 %v2152_v51 }
 0xf10   : > { %3070 = vmatprep.subr.msk.bf16.mxu1 %vm1323_vm8, %v2166_v2 }
 0xf13   : > { %3033 = vmatpush3.bf16.msra.mxu1 %v2170_v3 }
 0xf14   : > { %3071 = vmatprep.subr.msk.bf16.mxu1 %vm1323_vm8, %v2168_v4 }
 0xf15   : > { %v2193_v12 = vpop.permute.xlu0 %2192 }
 0xf16   : > { %v2188_v7 = vpop.permute.xlu1 %2187 }
 0xf17   : > { %3035 = vmatpush3.bf16.msra.mxu1 %v2173_v5 }
 0xf19   : > { %v2203_v17 = vpop.permute.xlu0 %2202 }
 0xf1a   : > { %3037 = vmatmul.mubr.msk.bf16.vlgmr.msra.gmra.mrb[20].mxu1 %vm1144_vm1, %v3335_v6  ;;  %v2198_v13 = vpop.permute.xlu1 %2197 }
 0xf1d   : > { %v2294_v26 = vpop.permute.xlu0 %2293 }
 0xf1e   : > { %v2289_v25 = vpop.permute.xlu1 %2288 }
 0xf21   : > { %v2304_v32 = vpop.permute.xlu0 %2303 }
 0xf22   : > { %v2299_v27 = vpop.permute.xlu1 %2298 }
 0xf26   : > { %v2382_v46 = vpop.permute.xlu1 %2381 }
 0xfed   : > { %v3038_v14 = vpop.f32.mrb[20].mxu1 }
 0xfee   : > { %v2264_v15 = vadd.f32 %v3038_v14, %v2198_v13  ;;  %v2255_v16 = vpop.f32.mrb[21].mxu1 }
 0xfef   : > { %v2256_v40 = vadd.f32 %v2255_v16, %v2188_v7  ;;  %v3039_v8 = vpop.f32.mrb[22].mxu1 }
 0xff0   : > { %v2267_v9 = vadd.f32 %v3039_v8, %v2203_v17  ;;  %v2258_v10 = vpop.f32.mrb[23].mxu1  ;;  %v2272_v11 = vmax.f32 %v2264_v15, 0.0 }
 0xff1   : > { %v2259_v18 = vadd.f32 %v2258_v10, %v2193_v12  ;;  %v2270_v20 = vmax.f32 %v2256_v40, 0.0 }
 0xff2   : > { %v2273_v19 = vmax.f32 %v2267_v9, 0.0 }
 0xff3   : > { %v2271_v21 = vmax.f32 %v2259_v18, 0.0 }
 0xff4   : > { %v2285_v22 = vpack.c.bf16 %v2273_v19, %v2272_v11 }
 0xff5   : > { %v2284_v23 = vpack.c.bf16 %v2271_v21, %v2270_v20 }
 0xff7   : > { %3040 = vmatprep.subr.bf16.mxu0 %v2284_v23 }
 0xff8   : > { %3041 = vmatpush3.bf16.msra.mxu0 %v2284_v23 }
 0xff9   : > { %3042 = vmatprep.subr.bf16.mxu0 %v2285_v22 }
 0xffc   : > { %3043 = vmatpush3.bf16.msra.mxu0 %v2285_v22 }
 0xffd   : > { %3048 = vmatprep.subr.bf16.mxu0 %v4016_v57 }
 0xfff   : > { %3045 = vmatmul.mubr.msk.bf16.vlgmr.msra.gmra.mrb[24].mxu0 %vm1244_vm5, %v3337_v24 }
0x1000   : > { %3052 = vmatprep.mubr.msk.bf16.mxu0 %vm4017_vm12, %v4016_v57 }
0x10d2   : > { %v3046_v28 = vpop.f32.mrb[24].mxu0 }
0x10d3   : > { %v2365_v29 = vadd.f32 %v3046_v28, %v2299_v27  ;;  %v2356_v30 = vpop.f32.mrb[25].mxu0 }
0x10d4   : > { %v2357_v33 = vadd.f32 %v2356_v30, %v2289_v25  ;;  %v3047_v34 = vpop.f32.mrb[26].mxu0 }
0x10d5   : > { %v2368_v35 = vadd.f32 %v3047_v34, %v2304_v32  ;;  %v2359_v36 = vpop.f32.mrb[27].mxu0  ;;  %v2373_v38 = vadd.f32 %v2365_v29, %v4883_v47 }
0x10d6   : > { %v2360_v37 = vadd.f32 %v2359_v36, %v2294_v26  ;;  %v2371_v41 = vadd.f32 %v2357_v33, %v4889_v49 }
0x10d7   : > { %v2374_v39 = vadd.f32 %v2368_v35, %v4886_v48 }
0x10d8   : > { %v2372_v42 = vadd.f32 %v2360_v37, %v4892_v50 }
0x10d9   : > { %v2378_v43 = vpack.c.bf16 %v2374_v39, %v2373_v38 }
0x10da   : > { %v2377_v44 = vpack.c.bf16 %v2372_v42, %v2371_v41 }
0x10dc   : > { %3049 = vmatpush3.bf16.msra.mxu0 %v2377_v44 }
0x10dd   : > { %3050 = vmatprep.subr.bf16.mxu0 %v4016_v57 }
0x10e0   : > { %3051 = vmatpush3.bf16.msra.mxu0 %v2378_v43 }
0x10e3   : > { %3053 = vmatmul.mubr.msk.bf16.vlgmr.msra.gmra.mrb[28].mxu0 %vm1244_vm5, %v2375_v45 }
0x11b6   : > { %v2421_v47 = vpop.f32.mrb[28].mxu0 }
0x11b7   : > { %v2422_v57 = vadd.f32 %v2421_v47, %v2382_v46  ;;  %v3054_v48 = vpop.f32.mrb[29].mxu0 }
0x11b8   : > { %v2424_v49 = vpop.f32.mrb[30].mxu0 }
0x11b9   : > { %2820 = vst.msk [vmem:[%s4843_s2 + $0x4] sm:$0x7] %vm1808_vm14, %v2422_v57  ;;  %v3055_v50 = vpop.f32.mrb[31].mxu0 }
0x11ba   : > { %3891 = shalt.err (!%p3888_p9)
}
0x11bb   : > { %s3892_s28 = scalar_lea.hbm %s4934_s30, 128  ;;  %s3896_s6 = scalar_lea.hbm %s5110_s14, 256 }
0x11bc   : > { %p3893_p4 = scmp.ne.s32.totalorder %s4934_s30, %s3892_s28  ;;  %p3897_p3 = scmp.lt.u32.totalorder %s4934_s30, %s5110_s14 }
0x11bd   : > { %p3898_p12 = scmp.lt.u32.totalorder %s3896_s6, %s3892_s28  ;;  %p3900_p13 = scmp.lt.u32.totalorder %s3892_s28, %s4934_s30 }
0x11be   : > { %p3894_p8 = pnand %p3893_p4, %p5111_p0 }
0x11bf   : > { %p3899_p1 = por %p3898_p12, %p3897_p3 }
0x11c0   : > { %p3895_p11 = pneg %p3894_p8 }
0x11c1   : > { %p3901_p7 = por %p3900_p13, %p3899_p1 }
0x11c3   : > { %p3902_p2 = pnand %p3901_p7, %p3895_p11 }
0x11c5   : > { %3905 = shalt.err (!%p3902_p2)
}
0x11c6   : > { %s4020_s2 = smov 64   ;;  %s4021_s12 = smov 128  }
0x11c7   : > { %3144 = dma.vmem_to_hbm [thread:$0]  (%p5111_p0), %s4929_s4, 128, %s4934_s30, %s2430_s5, %s4020_s2, %s4021_s12, %s4014_s8  }
0x11c8 PF: > { %s5112_s13 = sld [smem:[#allocation45_spill]]  ;;  %s5113_s29 = sld [smem:[#allocation48_spill]] }
0x11c9   : > { %p5114_p6 = scmp.ne.s32.totalorder %s5077_s20, 0 }
0x11ce   : > { %s2457_s1 = sand.u32 1, %s5112_s13   ;;  %p5115_p10 = scmp.ge.s32.totalorder %s5113_s29, 2 }
0x11cf   : > { %s2458_s22 = scalar_lea.sflag [#allocation4], %s2457_s1 }
0x11d0   : > { %p3206_p5 = pnand %p5115_p10, %p5114_p6 }
0x11d2   : > { %3967 = dma.done.wait (!%p3206_p5), %s2458_s22, 128  }
0x11d3   : > { %3969 = vsyncadd (!%p3206_p5), %s2458_s22, 4294967168  ;;  %s5116_s0 = sld [smem:[#allocation46_spill]]  ;;  %s5117_s30 = sld [smem:[#allocation47_spill]] }
0x11d4   : > { %p43_p9 = scmp.ge.s32.totalorder %s4556_s21, 4   ;;  %s5118_s20 = smov %s4568_s23 }
0x11d6   :  { %45 = sbr.rel (!%p43_p9) target bundleno = 34 (0x22), region = 235 }
0x11dd   :  { %2463 = vsyncpa [#allocation3], 1 }
0x11de   :  { %2465 = vsyncpa [#allocation3 + $0x1], 1 }
0x11df   :  { %2466 = vsyncpa [#allocation6], 1 }
0x11e0   :  { %2468 = vsyncpa [#allocation6 + $0x1], 1 }
0x11e1   :  { %2469 = vsyncpa [#allocation9], 1 }
0x11e2   :  { %2470 = vsyncpa [#allocation12], 1 }
0x11e3   :  { %2471 = vsyncpa [#allocation15], 1 }
0x11e4   :  { %2472 = vsyncpa [#allocation18], 1 }
0x11e5   :  { %2473 = vsyncpa [#allocation21], 1 }
0x11e6   :  { %2474 = vsyncpa [#allocation24], 1 }
0x11e7   :  { %2475 = vsyncpa [#allocation27], 1 }
0x11e8   :  { %2476 = vsyncpa [#allocation30], 1 }
0x11e9   :  { %2477 = vsyncpa [#allocation4], 1 }
0x11ea   :  { %2479 = vsyncpa [#allocation4 + $0x1], 1 }

</bundles_post_ra>
